<compile_context>
chip_gen: v6e
topology: v6e:2x2x1
jax: 0.10.0
libtpu: 0.0.40
codegen_flags: <defaults>
</compile_context>

<pallas_src>
import functools

import jax
import jax.numpy as jnp
from jax.experimental import pallas as pl
from jax.experimental.pallas import tpu as pltpu


# ----------------------------- fused Pallas kernel ---------------------------
def _bidir_regu_kernel(gates_ref, whh_ref, h0_ref, c0_ref,
                       out_ref, hT_ref, cT_ref, h_sc, c_sc,
                       *, t_chunk, hidden):
    """One grid step = one direction (axis 0) x one time chunk (axis 1).

    Block shapes seen by the kernel:
      gates_ref : (t_chunk, 4, B, H) bf16  planes = [f_pre, o_pre, tanh(g), x]
                  (the reverse direction's planes are already time-reversed)
      whh_ref   : (H, 2H) bf16             [Wfh | Woh] for this direction
      h0_ref, c0_ref : (B, H)              initial state for this direction
      out_ref   : (t_chunk, B, H)          this direction's output slab
      hT_ref, cT_ref : (B, H)              final state (written once, last chunk)
      h_sc, c_sc : (B, H) f32 VMEM         recurrent carry across chunks
    """
    c_idx = pl.program_id(1)          # chunk index along the recurrence
    H = hidden

    @pl.when(c_idx == 0)
    def _():
        h_sc[...] = h0_ref[...].astype(jnp.float32)
        c_sc[...] = c0_ref[...].astype(jnp.float32)

    whh = whh_ref[...]                # (H, 2H) bf16, loaded once per chunk

    # Recurrent carry lives in vregs for the whole (unrolled) chunk.
    h = h_sc[...]
    c = c_sc[...]
    for i in range(t_chunk):          # static local time (inputs pre-reversed)
        f_pre = gates_ref[i, 0].astype(jnp.float32)    # (B, H)
        o_pre = gates_ref[i, 1].astype(jnp.float32)
        g     = gates_ref[i, 2].astype(jnp.float32)    # tanh already applied
        xt    = gates_ref[i, 3].astype(jnp.float32)    # residual input

        # Single recurrent MXU dot per step: h @ [Wfh | Woh], f32 accumulation.
        hp = jnp.dot(h.astype(jnp.bfloat16), whh,
                     preferred_element_type=jnp.float32)           # (B, 2H)
        f = jax.nn.sigmoid(f_pre + hp[:, :H])
        o = jax.nn.sigmoid(o_pre + hp[:, H:])

        c = f * c + (1.0 - f) * g
        h = o * c + (1.0 - o) * xt    # residual path (I == H)
        out_ref[i] = h.astype(out_ref.dtype)

    # One scratch writeback per chunk (not per timestep).
    h_sc[...] = h
    c_sc[...] = c

    @pl.when(c_idx == pl.num_programs(1) - 1)
    def _():
        hT_ref[...] = h.astype(hT_ref.dtype)
        cT_ref[...] = c.astype(cT_ref.dtype)


# ------------------------------- helpers --------------------------------------
def _pack_params(fwd_params, rev_params):
    wi, bi, whh = [], [], []
    for p in (fwd_params, rev_params):
        wfi, woi, wci, wfh, woh, bf, bo, bc = p
        wi.append(jnp.stack([wfi, woi, wci]))               # (3, I, H)
        bi.append(jnp.stack([bf[0], bo[0], bc[0]]))         # (3, H)
        whh.append(jnp.concatenate([wfh, woh], axis=1))     # (H, 2H)
    return jnp.stack(wi), jnp.stack(bi), jnp.stack(whh)


def _vmem_capacity_bytes():
    try:
        return int(pltpu.get_tpu_info().vmem_capacity_bytes)
    except Exception:
        return 64 << 20            # conservative fallback (v7x per-core VMEM)


def _dimension_semantics():
    try:
        kind = jax.devices()[0].device_kind.lower()
    except Exception:
        kind = ""
    if "7" in kind:                # v7x: 2 TensorCores/chip -> real core sharding
        return (pltpu.CORE_PARALLEL, pltpu.ARBITRARY)
    return ("parallel", "arbitrary")


def _pick_chunk(T, B, H, out_itemsize, budget_bytes, max_unroll=64):
    # Double-buffered bf16 gates chunk (4 planes) + double-buffered output chunk.
    per_t = 2 * (4 * B * H * 2) + 2 * (B * H * out_itemsize)
    cap = max(1, min(budget_bytes // max(per_t, 1), max_unroll, T))
    for c in range(int(cap), 0, -1):
        if T % c == 0:
            return c
    return 1


# ------------------------------- wrapper --------------------------------------
@jax.jit
def bidir_regu_layer_pallas(x, fwd_params, rev_params, states):
    """BidirReGULayer.forward: (cat([fwd_out, rev_out], -1), [state_f, state_r])."""
    T, B, I = x.shape
    H = fwd_params[0].shape[-1]
    assert I == H, "ReGU residual path requires input_size == hidden_size"

    Wi, Bi, Whh = _pack_params(fwd_params, rev_params)      # (2,3,I,H),(2,3,H),(2,H,2H)
    Whh = Whh.astype(jnp.bfloat16)
    h0 = jnp.stack([states[0][0], states[1][0]])            # (2, B, H)
    c0 = jnp.stack([states[0][1], states[1][1]])            # (2, B, H)

    # Hoist every h-independent projection out of the recurrence: one matmul
    # over all (direction, gate, timestep), biases folded, tanh applied to g.
    xf = x.astype(jnp.float32)
    xproj = jnp.einsum('tbi,dgih->dtgbh', xf, Wi) + Bi[:, None, :, None, :]   # (2,T,3,B,H)
    xres = jnp.broadcast_to(xf[None], (2, T, B, H))
    gates = jnp.stack([xproj[:, :, 0], xproj[:, :, 1],
                       jnp.tanh(xproj[:, :, 2]), xres], axis=2)               # (2,T,4,B,H)
    # Pre-reverse the reverse direction so the kernel walks static local time.
    gates = jnp.concatenate([gates[:1], gates[1:, ::-1]], axis=0)
    gates = gates.astype(jnp.bfloat16)

    vmem_cap = _vmem_capacity_bytes()
    out_itemsize = jnp.dtype(x.dtype).itemsize
    t_chunk = _pick_chunk(T, B, H, out_itemsize, budget_bytes=vmem_cap // 2)
    n_chunks = T // t_chunk

    kernel = functools.partial(_bidir_regu_kernel, t_chunk=t_chunk, hidden=H)

    out, hT, cT = pl.pallas_call(
        kernel,
        out_shape=(
            jax.ShapeDtypeStruct((2, T, B, H), x.dtype),     # per-direction outputs
            jax.ShapeDtypeStruct((2, B, H), x.dtype),        # final h per direction
            jax.ShapeDtypeStruct((2, B, H), x.dtype),        # final c per direction
        ),
        grid_spec=pltpu.PrefetchScalarGridSpec(
            num_scalar_prefetch=0,
            grid=(2, n_chunks),                              # (direction, time chunk)
            in_specs=[
                pl.BlockSpec((pl.Squeezed(), t_chunk, 4, B, H),
                             lambda d, c: (d, c, 0, 0, 0)),          # gates (bf16)
                pl.BlockSpec((pl.Squeezed(), H, 2 * H),
                             lambda d, c: (d, 0, 0)),                # [Wfh|Woh]
                pl.BlockSpec((pl.Squeezed(), B, H),
                             lambda d, c: (d, 0, 0)),                # h0
                pl.BlockSpec((pl.Squeezed(), B, H),
                             lambda d, c: (d, 0, 0)),                # c0
            ],
            out_specs=(
                pl.BlockSpec((pl.Squeezed(), t_chunk, B, H),
                             lambda d, c: (d, c, 0, 0)),
                pl.BlockSpec((pl.Squeezed(), B, H), lambda d, c: (d, 0, 0)),
                pl.BlockSpec((pl.Squeezed(), B, H), lambda d, c: (d, 0, 0)),
            ),
            scratch_shapes=[pltpu.VMEM((B, H), jnp.float32),
                            pltpu.VMEM((B, H), jnp.float32)],
        ),
        compiler_params=pltpu.CompilerParams(
            dimension_semantics=_dimension_semantics(),      # dir across cores on v7x
            vmem_limit_bytes=int(vmem_cap * 3 // 4)),
    )(gates, Whh, h0, c0)

    # Direction 1 was produced in reversed time (pre-reversed inputs); flip it
    # back fused into the feature-axis concat (one XLA copy over the output).
    # TODO(synk): when H % 128 == 0, write each direction straight into a
    # (T, B, 2H) output block at lane offset d*H and drop this concat entirely.
    output = jnp.concatenate([out[0], out[1][::-1]], axis=-1)          # (T, B, 2H)
    out_states = [(hT[0], cT[0]), (hT[1], cT[1])]
    return output, out_states


# ------------------------------ pure-JAX reference ---------------------------
def _regu_layer_ref(x, params, state, reverse=False):
    wfi, woi, wci, wfh, woh, bf, bo, bc = params
    xs = x[::-1] if reverse else x

    def step(carry, xt):
        h, c = carry
        f = jax.nn.sigmoid(xt @ wfi + h @ wfh + bf)
        o = jax.nn.sigmoid(xt @ woi + h @ woh + bo)
        g = jnp.tanh(xt @ wci + bc)
        c_new = f * c + (1.0 - f) * g
        h_new = o * c_new + (1.0 - o) * xt
        return (h_new, c_new), h_new

    (hT, cT), ys = jax.lax.scan(step, state, xs)
    if reverse:
        ys = ys[::-1]
    return ys, (hT, cT)


def _bidir_ref(x, fwd_params, rev_params, states):
    out_f, sf = _regu_layer_ref(x, fwd_params, states[0], reverse=False)
    out_r, sr = _regu_layer_ref(x, rev_params, states[1], reverse=True)
    return jnp.concatenate([out_f, out_r], axis=-1), [sf, sr]


# ------------------------------ params ---------------------------------------
def init_cell_params(key, input_size, hidden_size, scale=0.1):
    ks = jax.random.split(key, 8)
    return (
        scale * jax.random.normal(ks[0], (input_size, hidden_size), jnp.float32),
        scale * jax.random.normal(ks[1], (input_size, hidden_size), jnp.float32),
        scale * jax.random.normal(ks[2], (input_size, hidden_size), jnp.float32),
        scale * jax.random.normal(ks[3], (hidden_size, hidden_size), jnp.float32),
        scale * jax.random.normal(ks[4], (hidden_size, hidden_size), jnp.float32),
        scale * jax.random.normal(ks[5], (1, hidden_size), jnp.float32),
        scale * jax.random.normal(ks[6], (1, hidden_size), jnp.float32),
        scale * jax.random.normal(ks[7], (1, hidden_size), jnp.float32),
    )


if __name__ == "__main__":
    T, B, H = 8, 2, 32          # seq_len, batch, hidden (input_size == hidden_size)
    key = jax.random.PRNGKey(0)
    kx, kh0, kc0, kh1, kc1, kpf, kpr = jax.random.split(key, 7)

    x = jax.random.normal(kx, (T, B, H), jnp.float32)
    states = [
        (jax.random.normal(kh0, (B, H), jnp.float32),
         jax.random.normal(kc0, (B, H), jnp.float32)),
        (jax.random.normal(kh1, (B, H), jnp.float32),
         jax.random.normal(kc1, (B, H), jnp.float32)),
    ]
    fwd_params = init_cell_params(kpf, H, H)
    rev_params = init_cell_params(kpr, H, H)

    out, out_states = bidir_regu_layer_pallas(x, fwd_params, rev_params, states)
    out = jax.block_until_ready(out)
    out_states = jax.tree_util.tree_map(jax.block_until_ready, out_states)

    # Sanity-check against the pure-JAX f32 reference.  Gate planes / recurrent
    # weights are stored in bf16 (recurrence itself is f32), so use a slightly
    # looser tolerance than a pure-f32 kernel would need.
    ref_out, ref_states = _bidir_ref(x, fwd_params, rev_params, states)
    assert out.shape == (T, B, 2 * H), out.shape
    assert jnp.allclose(out, ref_out, rtol=5e-2, atol=5e-2)
    for (h_p, c_p), (h_r, c_r) in zip(out_states, ref_states):
        assert jnp.allclose(h_p, h_r, rtol=5e-2, atol=5e-2)
        assert jnp.allclose(c_p, c_r, rtol=5e-2, atol=5e-2)

    print("KERNEL_OK")
</pallas_src>

<mosaic_0001>
module attributes {stable_mosaic.version = 11 : i64} {
  func.func @_bidir_regu_kernel(%arg0: i32, %arg1: i32, %arg2: memref<1x8x4x2x32xbf16, #tpu.memory_space<vmem>>, %arg3: memref<1x32x64xbf16, #tpu.memory_space<vmem>>, %arg4: memref<1x2x32xf32, #tpu.memory_space<vmem>>, %arg5: memref<1x2x32xf32, #tpu.memory_space<vmem>>, %arg6: memref<1x8x2x32xf32, #tpu.memory_space<vmem>>, %arg7: memref<1x2x32xf32, #tpu.memory_space<vmem>>, %arg8: memref<1x2x32xf32, #tpu.memory_space<vmem>>, %arg9: memref<2x32xf32, #tpu.memory_space<vmem>>, %arg10: memref<2x32xf32, #tpu.memory_space<vmem>>) attributes {dimension_semantics = [#tpu.dimension_semantics<parallel>, #tpu.dimension_semantics<arbitrary>], iteration_bounds = array<i64: 2, 1>, scalar_prefetch = 0 : i64, scratch_operands = 2 : i64, tpu.core_type = #tpu.core_type<tc>, window_params = [{transform_indices = @transform_0, window_bounds = array<i64: 1, 8, 4, 2, 32>}, {transform_indices = @transform_1, window_bounds = array<i64: 1, 32, 64>}, {transform_indices = @transform_2, window_bounds = array<i64: 1, 2, 32>}, {transform_indices = @transform_3, window_bounds = array<i64: 1, 2, 32>}, {transform_indices = @transform_4, window_bounds = array<i64: 1, 8, 2, 32>}, {transform_indices = @transform_5, window_bounds = array<i64: 1, 2, 32>}, {transform_indices = @transform_6, window_bounds = array<i64: 1, 2, 32>}]} {
    %c0_i32 = arith.constant 0 : i32
    %0 = arith.cmpi eq, %arg1, %c0_i32 : i32
    %1 = arith.extui %0 : i1 to i32
    %c0_i32_0 = arith.constant 0 : i32
    %2 = arith.cmpi ne, %1, %c0_i32_0 : i32
    scf.if %2 {
      %c0_237 = arith.constant 0 : index
      %c0_238 = arith.constant 0 : index
      %c0_239 = arith.constant 0 : index
      %340 = vector.load %arg4[%c0_237, %c0_238, %c0_239] : memref<1x2x32xf32, #tpu.memory_space<vmem>>, vector<1x2x32xf32>
      %341 = vector.shape_cast %340 : vector<1x2x32xf32> to vector<2x32xf32>
      %c0_240 = arith.constant 0 : index
      %c0_241 = arith.constant 0 : index
      %342 = vector.load %arg9[%c0_240, %c0_241] : memref<2x32xf32, #tpu.memory_space<vmem>>, vector<2x32xf32>
      tpu.vector_store %arg9[%c0_240, %c0_241], %341 {strides = array<i32>} : memref<2x32xf32, #tpu.memory_space<vmem>>, vector<2x32xf32>,
      %c0_242 = arith.constant 0 : index
      %c0_243 = arith.constant 0 : index
      %c0_244 = arith.constant 0 : index
      %343 = vector.load %arg5[%c0_242, %c0_243, %c0_244] : memref<1x2x32xf32, #tpu.memory_space<vmem>>, vector<1x2x32xf32>
      %344 = vector.shape_cast %343 : vector<1x2x32xf32> to vector<2x32xf32>
      %c0_245 = arith.constant 0 : index
      %c0_246 = arith.constant 0 : index
      %345 = vector.load %arg10[%c0_245, %c0_246] : memref<2x32xf32, #tpu.memory_space<vmem>>, vector<2x32xf32>
      tpu.vector_store %arg10[%c0_245, %c0_246], %344 {strides = array<i32>} : memref<2x32xf32, #tpu.memory_space<vmem>>, vector<2x32xf32>,
    } else {
    }
    %c0 = arith.constant 0 : index
    %c0_1 = arith.constant 0 : index
    %c0_2 = arith.constant 0 : index
    %3 = vector.load %arg3[%c0, %c0_1, %c0_2] : memref<1x32x64xbf16, #tpu.memory_space<vmem>>, vector<1x32x64xbf16>
    %4 = vector.shape_cast %3 : vector<1x32x64xbf16> to vector<32x64xbf16>
    %c0_3 = arith.constant 0 : index
    %c0_4 = arith.constant 0 : index
    %5 = vector.load %arg9[%c0_3, %c0_4] : memref<2x32xf32, #tpu.memory_space<vmem>>, vector<2x32xf32>
    %c0_5 = arith.constant 0 : index
    %c0_6 = arith.constant 0 : index
    %6 = vector.load %arg10[%c0_5, %c0_6] : memref<2x32xf32, #tpu.memory_space<vmem>>, vector<2x32xf32>
    %c0_7 = arith.constant 0 : index
    %c0_8 = arith.constant 0 : index
    %c0_9 = arith.constant 0 : index
    %c0_10 = arith.constant 0 : index
    %c0_11 = arith.constant 0 : index
    %7 = vector.load %arg2[%c0_7, %c0_8, %c0_9, %c0_10, %c0_11] : memref<1x8x4x2x32xbf16, #tpu.memory_space<vmem>>, vector<1x1x1x2x32xbf16>
    %8 = vector.shape_cast %7 : vector<1x1x1x2x32xbf16> to vector<2x32xbf16>
    %9 = arith.extf %8 : vector<2x32xbf16> to vector<2x32xf32>
    %c0_12 = arith.constant 0 : index
    %c0_13 = arith.constant 0 : index
    %c1 = arith.constant 1 : index
    %c0_14 = arith.constant 0 : index
    %c0_15 = arith.constant 0 : index
    %10 = vector.load %arg2[%c0_12, %c0_13, %c1, %c0_14, %c0_15] : memref<1x8x4x2x32xbf16, #tpu.memory_space<vmem>>, vector<1x1x1x2x32xbf16>
    %11 = vector.shape_cast %10 : vector<1x1x1x2x32xbf16> to vector<2x32xbf16>
    %12 = arith.extf %11 : vector<2x32xbf16> to vector<2x32xf32>
    %c0_16 = arith.constant 0 : index
    %c0_17 = arith.constant 0 : index
    %c2 = arith.constant 2 : index
    %c0_18 = arith.constant 0 : index
    %c0_19 = arith.constant 0 : index
    %13 = vector.load %arg2[%c0_16, %c0_17, %c2, %c0_18, %c0_19] : memref<1x8x4x2x32xbf16, #tpu.memory_space<vmem>>, vector<1x1x1x2x32xbf16>
    %14 = vector.shape_cast %13 : vector<1x1x1x2x32xbf16> to vector<2x32xbf16>
    %15 = arith.extf %14 : vector<2x32xbf16> to vector<2x32xf32>
    %c0_20 = arith.constant 0 : index
    %c0_21 = arith.constant 0 : index
    %c3 = arith.constant 3 : index
    %c0_22 = arith.constant 0 : index
    %c0_23 = arith.constant 0 : index
    %16 = vector.load %arg2[%c0_20, %c0_21, %c3, %c0_22, %c0_23] : memref<1x8x4x2x32xbf16, #tpu.memory_space<vmem>>, vector<1x1x1x2x32xbf16>
    %17 = vector.shape_cast %16 : vector<1x1x1x2x32xbf16> to vector<2x32xbf16>
    %18 = arith.extf %17 : vector<2x32xbf16> to vector<2x32xf32>
    %19 = arith.truncf %5 : vector<2x32xf32> to vector<2x32xbf16>
    %cst = arith.constant dense<0.000000e+00> : vector<2x64xf32>
    %20 = tpu.matmul %19, %4, %cst {dimension_numbers = #tpu.dot_dimension_numbers<[1], [0], [0], [1], [0, 0, 1, 1], [], []>} : vector<2x32xbf16>, vector<32x64xbf16>, vector<2x64xf32> -> vector<2x64xf32>
    %21 = vector.extract_strided_slice %20 {offsets = [0, 0], sizes = [2, 32], strides = [1, 1]} : vector<2x64xf32> to vector<2x32xf32>
    %22 = arith.addf %9, %21 : vector<2x32xf32>
    %23 = arith.negf %22 : vector<2x32xf32>
    %24 = math.exp %23 : vector<2x32xf32>
    %cst_24 = arith.constant 1.000000e+00 : f32
    %25 = vector.broadcast %cst_24 : f32 to vector<2x32xf32>
    %26 = arith.addf %25, %24 : vector<2x32xf32>
    %27 = arith.divf %25, %26 : vector<2x32xf32>
    %28 = vector.extract_strided_slice %20 {offsets = [0, 32], sizes = [2, 32], strides = [1, 1]} : vector<2x64xf32> to vector<2x32xf32>
    %29 = arith.addf %12, %28 : vector<2x32xf32>
    %30 = arith.negf %29 : vector<2x32xf32>
    %31 = math.exp %30 : vector<2x32xf32>
    %cst_25 = arith.constant 1.000000e+00 : f32
    %32 = vector.broadcast %cst_25 : f32 to vector<2x32xf32>
    %33 = arith.addf %32, %31 : vector<2x32xf32>
    %34 = arith.divf %32, %33 : vector<2x32xf32>
    %35 = arith.mulf %27, %6 : vector<2x32xf32>
    %cst_26 = arith.constant 1.000000e+00 : f32
    %36 = vector.broadcast %cst_26 : f32 to vector<2x32xf32>
    %37 = arith.subf %36, %27 : vector<2x32xf32>
    %38 = arith.mulf %37, %15 : vector<2x32xf32>
    %39 = arith.addf %35, %38 : vector<2x32xf32>
    %40 = arith.mulf %34, %39 : vector<2x32xf32>
    %cst_27 = arith.constant 1.000000e+00 : f32
    %41 = vector.broadcast %cst_27 : f32 to vector<2x32xf32>
    %42 = arith.subf %41, %34 : vector<2x32xf32>
    %43 = arith.mulf %42, %18 : vector<2x32xf32>
    %44 = arith.addf %40, %43 : vector<2x32xf32>
    %c0_28 = arith.constant 0 : index
    %c0_29 = arith.constant 0 : index
    %c0_30 = arith.constant 0 : index
    %c0_31 = arith.constant 0 : index
    %45 = vector.load %arg6[%c0_28, %c0_29, %c0_30, %c0_31] : memref<1x8x2x32xf32, #tpu.memory_space<vmem>>, vector<1x1x2x32xf32>
    %46 = vector.shape_cast %45 : vector<1x1x2x32xf32> to vector<2x32xf32>
    %47 = vector.shape_cast %44 : vector<2x32xf32> to vector<1x1x2x32xf32>
    tpu.vector_store %arg6[%c0_28, %c0_29, %c0_30, %c0_31], %47 {strides = array<i32>} : memref<1x8x2x32xf32, #tpu.memory_space<vmem>>, vector<1x1x2x32xf32>,
    %c0_32 = arith.constant 0 : index
    %c1_33 = arith.constant 1 : index
    %c0_34 = arith.constant 0 : index
    %c0_35 = arith.constant 0 : index
    %c0_36 = arith.constant 0 : index
    %48 = vector.load %arg2[%c0_32, %c1_33, %c0_34, %c0_35, %c0_36] : memref<1x8x4x2x32xbf16, #tpu.memory_space<vmem>>, vector<1x1x1x2x32xbf16>
    %49 = vector.shape_cast %48 : vector<1x1x1x2x32xbf16> to vector<2x32xbf16>
    %50 = arith.extf %49 : vector<2x32xbf16> to vector<2x32xf32>
    %c0_37 = arith.constant 0 : index
    %c1_38 = arith.constant 1 : index
    %c1_39 = arith.constant 1 : index
    %c0_40 = arith.constant 0 : index
    %c0_41 = arith.constant 0 : index
    %51 = vector.load %arg2[%c0_37, %c1_38, %c1_39, %c0_40, %c0_41] : memref<1x8x4x2x32xbf16, #tpu.memory_space<vmem>>, vector<1x1x1x2x32xbf16>
    %52 = vector.shape_cast %51 : vector<1x1x1x2x32xbf16> to vector<2x32xbf16>
    %53 = arith.extf %52 : vector<2x32xbf16> to vector<2x32xf32>
    %c0_42 = arith.constant 0 : index
    %c1_43 = arith.constant 1 : index
    %c2_44 = arith.constant 2 : index
    %c0_45 = arith.constant 0 : index
    %c0_46 = arith.constant 0 : index
    %54 = vector.load %arg2[%c0_42, %c1_43, %c2_44, %c0_45, %c0_46] : memref<1x8x4x2x32xbf16, #tpu.memory_space<vmem>>, vector<1x1x1x2x32xbf16>
    %55 = vector.shape_cast %54 : vector<1x1x1x2x32xbf16> to vector<2x32xbf16>
    %56 = arith.extf %55 : vector<2x32xbf16> to vector<2x32xf32>
    %c0_47 = arith.constant 0 : index
    %c1_48 = arith.constant 1 : index
    %c3_49 = arith.constant 3 : index
    %c0_50 = arith.constant 0 : index
    %c0_51 = arith.constant 0 : index
    %57 = vector.load %arg2[%c0_47, %c1_48, %c3_49, %c0_50, %c0_51] : memref<1x8x4x2x32xbf16, #tpu.memory_space<vmem>>, vector<1x1x1x2x32xbf16>
    %58 = vector.shape_cast %57 : vector<1x1x1x2x32xbf16> to vector<2x32xbf16>
    %59 = arith.extf %58 : vector<2x32xbf16> to vector<2x32xf32>
    %60 = arith.truncf %44 : vector<2x32xf32> to vector<2x32xbf16>
    %cst_52 = arith.constant dense<0.000000e+00> : vector<2x64xf32>
    %61 = tpu.matmul %60, %4, %cst_52 {dimension_numbers = #tpu.dot_dimension_numbers<[1], [0], [0], [1], [0, 0, 1, 1], [], []>} : vector<2x32xbf16>, vector<32x64xbf16>, vector<2x64xf32> -> vector<2x64xf32>
    %62 = vector.extract_strided_slice %61 {offsets = [0, 0], sizes = [2, 32], strides = [1, 1]} : vector<2x64xf32> to vector<2x32xf32>
    %63 = arith.addf %50, %62 : vector<2x32xf32>
    %64 = arith.negf %63 : vector<2x32xf32>
    %65 = math.exp %64 : vector<2x32xf32>
    %cst_53 = arith.constant 1.000000e+00 : f32
    %66 = vector.broadcast %cst_53 : f32 to vector<2x32xf32>
    %67 = arith.addf %66, %65 : vector<2x32xf32>
    %68 = arith.divf %66, %67 : vector<2x32xf32>
    %69 = vector.extract_strided_slice %61 {offsets = [0, 32], sizes = [2, 32], strides = [1, 1]} : vector<2x64xf32> to vector<2x32xf32>
    %70 = arith.addf %53, %69 : vector<2x32xf32>
    %71 = arith.negf %70 : vector<2x32xf32>
    %72 = math.exp %71 : vector<2x32xf32>
    %cst_54 = arith.constant 1.000000e+00 : f32
    %73 = vector.broadcast %cst_54 : f32 to vector<2x32xf32>
    %74 = arith.addf %73, %72 : vector<2x32xf32>
    %75 = arith.divf %73, %74 : vector<2x32xf32>
    %76 = arith.mulf %68, %39 : vector<2x32xf32>
    %cst_55 = arith.constant 1.000000e+00 : f32
    %77 = vector.broadcast %cst_55 : f32 to vector<2x32xf32>
    %78 = arith.subf %77, %68 : vector<2x32xf32>
    %79 = arith.mulf %78, %56 : vector<2x32xf32>
    %80 = arith.addf %76, %79 : vector<2x32xf32>
    %81 = arith.mulf %75, %80 : vector<2x32xf32>
    %cst_56 = arith.constant 1.000000e+00 : f32
    %82 = vector.broadcast %cst_56 : f32 to vector<2x32xf32>
    %83 = arith.subf %82, %75 : vector<2x32xf32>
    %84 = arith.mulf %83, %59 : vector<2x32xf32>
    %85 = arith.addf %81, %84 : vector<2x32xf32>
    %c0_57 = arith.constant 0 : index
    %c1_58 = arith.constant 1 : index
    %c0_59 = arith.constant 0 : index
    %c0_60 = arith.constant 0 : index
    %86 = vector.load %arg6[%c0_57, %c1_58, %c0_59, %c0_60] : memref<1x8x2x32xf32, #tpu.memory_space<vmem>>, vector<1x1x2x32xf32>
    %87 = vector.shape_cast %86 : vector<1x1x2x32xf32> to vector<2x32xf32>
    %88 = vector.shape_cast %85 : vector<2x32xf32> to vector<1x1x2x32xf32>
    tpu.vector_store %arg6[%c0_57, %c1_58, %c0_59, %c0_60], %88 {strides = array<i32>} : memref<1x8x2x32xf32, #tpu.memory_space<vmem>>, vector<1x1x2x32xf32>,
    %c0_61 = arith.constant 0 : index
    %c2_62 = arith.constant 2 : index
    %c0_63 = arith.constant 0 : index
    %c0_64 = arith.constant 0 : index
    %c0_65 = arith.constant 0 : index
    %89 = vector.load %arg2[%c0_61, %c2_62, %c0_63, %c0_64, %c0_65] : memref<1x8x4x2x32xbf16, #tpu.memory_space<vmem>>, vector<1x1x1x2x32xbf16>
    %90 = vector.shape_cast %89 : vector<1x1x1x2x32xbf16> to vector<2x32xbf16>
    %91 = arith.extf %90 : vector<2x32xbf16> to vector<2x32xf32>
    %c0_66 = arith.constant 0 : index
    %c2_67 = arith.constant 2 : index
    %c1_68 = arith.constant 1 : index
    %c0_69 = arith.constant 0 : index
    %c0_70 = arith.constant 0 : index
    %92 = vector.load %arg2[%c0_66, %c2_67, %c1_68, %c0_69, %c0_70] : memref<1x8x4x2x32xbf16, #tpu.memory_space<vmem>>, vector<1x1x1x2x32xbf16>
    %93 = vector.shape_cast %92 : vector<1x1x1x2x32xbf16> to vector<2x32xbf16>
    %94 = arith.extf %93 : vector<2x32xbf16> to vector<2x32xf32>
    %c0_71 = arith.constant 0 : index
    %c2_72 = arith.constant 2 : index
    %c2_73 = arith.constant 2 : index
    %c0_74 = arith.constant 0 : index
    %c0_75 = arith.constant 0 : index
    %95 = vector.load %arg2[%c0_71, %c2_72, %c2_73, %c0_74, %c0_75] : memref<1x8x4x2x32xbf16, #tpu.memory_space<vmem>>, vector<1x1x1x2x32xbf16>
    %96 = vector.shape_cast %95 : vector<1x1x1x2x32xbf16> to vector<2x32xbf16>
    %97 = arith.extf %96 : vector<2x32xbf16> to vector<2x32xf32>
    %c0_76 = arith.constant 0 : index
    %c2_77 = arith.constant 2 : index
    %c3_78 = arith.constant 3 : index
    %c0_79 = arith.constant 0 : index
    %c0_80 = arith.constant 0 : index
    %98 = vector.load %arg2[%c0_76, %c2_77, %c3_78, %c0_79, %c0_80] : memref<1x8x4x2x32xbf16, #tpu.memory_space<vmem>>, vector<1x1x1x2x32xbf16>
    %99 = vector.shape_cast %98 : vector<1x1x1x2x32xbf16> to vector<2x32xbf16>
    %100 = arith.extf %99 : vector<2x32xbf16> to vector<2x32xf32>
    %101 = arith.truncf %85 : vector<2x32xf32> to vector<2x32xbf16>
    %cst_81 = arith.constant dense<0.000000e+00> : vector<2x64xf32>
    %102 = tpu.matmul %101, %4, %cst_81 {dimension_numbers = #tpu.dot_dimension_numbers<[1], [0], [0], [1], [0, 0, 1, 1], [], []>} : vector<2x32xbf16>, vector<32x64xbf16>, vector<2x64xf32> -> vector<2x64xf32>
    %103 = vector.extract_strided_slice %102 {offsets = [0, 0], sizes = [2, 32], strides = [1, 1]} : vector<2x64xf32> to vector<2x32xf32>
    %104 = arith.addf %91, %103 : vector<2x32xf32>
    %105 = arith.negf %104 : vector<2x32xf32>
    %106 = math.exp %105 : vector<2x32xf32>
    %cst_82 = arith.constant 1.000000e+00 : f32
    %107 = vector.broadcast %cst_82 : f32 to vector<2x32xf32>
    %108 = arith.addf %107, %106 : vector<2x32xf32>
    %109 = arith.divf %107, %108 : vector<2x32xf32>
    %110 = vector.extract_strided_slice %102 {offsets = [0, 32], sizes = [2, 32], strides = [1, 1]} : vector<2x64xf32> to vector<2x32xf32>
    %111 = arith.addf %94, %110 : vector<2x32xf32>
    %112 = arith.negf %111 : vector<2x32xf32>
    %113 = math.exp %112 : vector<2x32xf32>
    %cst_83 = arith.constant 1.000000e+00 : f32
    %114 = vector.broadcast %cst_83 : f32 to vector<2x32xf32>
    %115 = arith.addf %114, %113 : vector<2x32xf32>
    %116 = arith.divf %114, %115 : vector<2x32xf32>
    %117 = arith.mulf %109, %80 : vector<2x32xf32>
    %cst_84 = arith.constant 1.000000e+00 : f32
    %118 = vector.broadcast %cst_84 : f32 to vector<2x32xf32>
    %119 = arith.subf %118, %109 : vector<2x32xf32>
    %120 = arith.mulf %119, %97 : vector<2x32xf32>
    %121 = arith.addf %117, %120 : vector<2x32xf32>
    %122 = arith.mulf %116, %121 : vector<2x32xf32>
    %cst_85 = arith.constant 1.000000e+00 : f32
    %123 = vector.broadcast %cst_85 : f32 to vector<2x32xf32>
    %124 = arith.subf %123, %116 : vector<2x32xf32>
    %125 = arith.mulf %124, %100 : vector<2x32xf32>
    %126 = arith.addf %122, %125 : vector<2x32xf32>
    %c0_86 = arith.constant 0 : index
    %c2_87 = arith.constant 2 : index
    %c0_88 = arith.constant 0 : index
    %c0_89 = arith.constant 0 : index
    %127 = vector.load %arg6[%c0_86, %c2_87, %c0_88, %c0_89] : memref<1x8x2x32xf32, #tpu.memory_space<vmem>>, vector<1x1x2x32xf32>
    %128 = vector.shape_cast %127 : vector<1x1x2x32xf32> to vector<2x32xf32>
    %129 = vector.shape_cast %126 : vector<2x32xf32> to vector<1x1x2x32xf32>
    tpu.vector_store %arg6[%c0_86, %c2_87, %c0_88, %c0_89], %129 {strides = array<i32>} : memref<1x8x2x32xf32, #tpu.memory_space<vmem>>, vector<1x1x2x32xf32>,
    %c0_90 = arith.constant 0 : index
    %c3_91 = arith.constant 3 : index
    %c0_92 = arith.constant 0 : index
    %c0_93 = arith.constant 0 : index
    %c0_94 = arith.constant 0 : index
    %130 = vector.load %arg2[%c0_90, %c3_91, %c0_92, %c0_93, %c0_94] : memref<1x8x4x2x32xbf16, #tpu.memory_space<vmem>>, vector<1x1x1x2x32xbf16>
    %131 = vector.shape_cast %130 : vector<1x1x1x2x32xbf16> to vector<2x32xbf16>
    %132 = arith.extf %131 : vector<2x32xbf16> to vector<2x32xf32>
    %c0_95 = arith.constant 0 : index
    %c3_96 = arith.constant 3 : index
    %c1_97 = arith.constant 1 : index
    %c0_98 = arith.constant 0 : index
    %c0_99 = arith.constant 0 : index
    %133 = vector.load %arg2[%c0_95, %c3_96, %c1_97, %c0_98, %c0_99] : memref<1x8x4x2x32xbf16, #tpu.memory_space<vmem>>, vector<1x1x1x2x32xbf16>
    %134 = vector.shape_cast %133 : vector<1x1x1x2x32xbf16> to vector<2x32xbf16>
    %135 = arith.extf %134 : vector<2x32xbf16> to vector<2x32xf32>
    %c0_100 = arith.constant 0 : index
    %c3_101 = arith.constant 3 : index
    %c2_102 = arith.constant 2 : index
    %c0_103 = arith.constant 0 : index
    %c0_104 = arith.constant 0 : index
    %136 = vector.load %arg2[%c0_100, %c3_101, %c2_102, %c0_103, %c0_104] : memref<1x8x4x2x32xbf16, #tpu.memory_space<vmem>>, vector<1x1x1x2x32xbf16>
    %137 = vector.shape_cast %136 : vector<1x1x1x2x32xbf16> to vector<2x32xbf16>
    %138 = arith.extf %137 : vector<2x32xbf16> to vector<2x32xf32>
    %c0_105 = arith.constant 0 : index
    %c3_106 = arith.constant 3 : index
    %c3_107 = arith.constant 3 : index
    %c0_108 = arith.constant 0 : index
    %c0_109 = arith.constant 0 : index
    %139 = vector.load %arg2[%c0_105, %c3_106, %c3_107, %c0_108, %c0_109] : memref<1x8x4x2x32xbf16, #tpu.memory_space<vmem>>, vector<1x1x1x2x32xbf16>
    %140 = vector.shape_cast %139 : vector<1x1x1x2x32xbf16> to vector<2x32xbf16>
    %141 = arith.extf %140 : vector<2x32xbf16> to vector<2x32xf32>
    %142 = arith.truncf %126 : vector<2x32xf32> to vector<2x32xbf16>
    %cst_110 = arith.constant dense<0.000000e+00> : vector<2x64xf32>
    %143 = tpu.matmul %142, %4, %cst_110 {dimension_numbers = #tpu.dot_dimension_numbers<[1], [0], [0], [1], [0, 0, 1, 1], [], []>} : vector<2x32xbf16>, vector<32x64xbf16>, vector<2x64xf32> -> vector<2x64xf32>
    %144 = vector.extract_strided_slice %143 {offsets = [0, 0], sizes = [2, 32], strides = [1, 1]} : vector<2x64xf32> to vector<2x32xf32>
    %145 = arith.addf %132, %144 : vector<2x32xf32>
    %146 = arith.negf %145 : vector<2x32xf32>
    %147 = math.exp %146 : vector<2x32xf32>
    %cst_111 = arith.constant 1.000000e+00 : f32
    %148 = vector.broadcast %cst_111 : f32 to vector<2x32xf32>
    %149 = arith.addf %148, %147 : vector<2x32xf32>
    %150 = arith.divf %148, %149 : vector<2x32xf32>
    %151 = vector.extract_strided_slice %143 {offsets = [0, 32], sizes = [2, 32], strides = [1, 1]} : vector<2x64xf32> to vector<2x32xf32>
    %152 = arith.addf %135, %151 : vector<2x32xf32>
    %153 = arith.negf %152 : vector<2x32xf32>
    %154 = math.exp %153 : vector<2x32xf32>
    %cst_112 = arith.constant 1.000000e+00 : f32
    %155 = vector.broadcast %cst_112 : f32 to vector<2x32xf32>
    %156 = arith.addf %155, %154 : vector<2x32xf32>
    %157 = arith.divf %155, %156 : vector<2x32xf32>
    %158 = arith.mulf %150, %121 : vector<2x32xf32>
    %cst_113 = arith.constant 1.000000e+00 : f32
    %159 = vector.broadcast %cst_113 : f32 to vector<2x32xf32>
    %160 = arith.subf %159, %150 : vector<2x32xf32>
    %161 = arith.mulf %160, %138 : vector<2x32xf32>
    %162 = arith.addf %158, %161 : vector<2x32xf32>
    %163 = arith.mulf %157, %162 : vector<2x32xf32>
    %cst_114 = arith.constant 1.000000e+00 : f32
    %164 = vector.broadcast %cst_114 : f32 to vector<2x32xf32>
    %165 = arith.subf %164, %157 : vector<2x32xf32>
    %166 = arith.mulf %165, %141 : vector<2x32xf32>
    %167 = arith.addf %163, %166 : vector<2x32xf32>
    %c0_115 = arith.constant 0 : index
    %c3_116 = arith.constant 3 : index
    %c0_117 = arith.constant 0 : index
    %c0_118 = arith.constant 0 : index
    %168 = vector.load %arg6[%c0_115, %c3_116, %c0_117, %c0_118] : memref<1x8x2x32xf32, #tpu.memory_space<vmem>>, vector<1x1x2x32xf32>
    %169 = vector.shape_cast %168 : vector<1x1x2x32xf32> to vector<2x32xf32>
    %170 = vector.shape_cast %167 : vector<2x32xf32> to vector<1x1x2x32xf32>
    tpu.vector_store %arg6[%c0_115, %c3_116, %c0_117, %c0_118], %170 {strides = array<i32>} : memref<1x8x2x32xf32, #tpu.memory_space<vmem>>, vector<1x1x2x32xf32>,
    %c0_119 = arith.constant 0 : index
    %c4 = arith.constant 4 : index
    %c0_120 = arith.constant 0 : index
    %c0_121 = arith.constant 0 : index
    %c0_122 = arith.constant 0 : index
    %171 = vector.load %arg2[%c0_119, %c4, %c0_120, %c0_121, %c0_122] : memref<1x8x4x2x32xbf16, #tpu.memory_space<vmem>>, vector<1x1x1x2x32xbf16>
    %172 = vector.shape_cast %171 : vector<1x1x1x2x32xbf16> to vector<2x32xbf16>
    %173 = arith.extf %172 : vector<2x32xbf16> to vector<2x32xf32>
    %c0_123 = arith.constant 0 : index
    %c4_124 = arith.constant 4 : index
    %c1_125 = arith.constant 1 : index
    %c0_126 = arith.constant 0 : index
    %c0_127 = arith.constant 0 : index
    %174 = vector.load %arg2[%c0_123, %c4_124, %c1_125, %c0_126, %c0_127] : memref<1x8x4x2x32xbf16, #tpu.memory_space<vmem>>, vector<1x1x1x2x32xbf16>
    %175 = vector.shape_cast %174 : vector<1x1x1x2x32xbf16> to vector<2x32xbf16>
    %176 = arith.extf %175 : vector<2x32xbf16> to vector<2x32xf32>
    %c0_128 = arith.constant 0 : index
    %c4_129 = arith.constant 4 : index
    %c2_130 = arith.constant 2 : index
    %c0_131 = arith.constant 0 : index
    %c0_132 = arith.constant 0 : index
    %177 = vector.load %arg2[%c0_128, %c4_129, %c2_130, %c0_131, %c0_132] : memref<1x8x4x2x32xbf16, #tpu.memory_space<vmem>>, vector<1x1x1x2x32xbf16>
    %178 = vector.shape_cast %177 : vector<1x1x1x2x32xbf16> to vector<2x32xbf16>
    %179 = arith.extf %178 : vector<2x32xbf16> to vector<2x32xf32>
    %c0_133 = arith.constant 0 : index
    %c4_134 = arith.constant 4 : index
    %c3_135 = arith.constant 3 : index
    %c0_136 = arith.constant 0 : index
    %c0_137 = arith.constant 0 : index
    %180 = vector.load %arg2[%c0_133, %c4_134, %c3_135, %c0_136, %c0_137] : memref<1x8x4x2x32xbf16, #tpu.memory_space<vmem>>, vector<1x1x1x2x32xbf16>
    %181 = vector.shape_cast %180 : vector<1x1x1x2x32xbf16> to vector<2x32xbf16>
    %182 = arith.extf %181 : vector<2x32xbf16> to vector<2x32xf32>
    %183 = arith.truncf %167 : vector<2x32xf32> to vector<2x32xbf16>
    %cst_138 = arith.constant dense<0.000000e+00> : vector<2x64xf32>
    %184 = tpu.matmul %183, %4, %cst_138 {dimension_numbers = #tpu.dot_dimension_numbers<[1], [0], [0], [1], [0, 0, 1, 1], [], []>} : vector<2x32xbf16>, vector<32x64xbf16>, vector<2x64xf32> -> vector<2x64xf32>
    %185 = vector.extract_strided_slice %184 {offsets = [0, 0], sizes = [2, 32], strides = [1, 1]} : vector<2x64xf32> to vector<2x32xf32>
    %186 = arith.addf %173, %185 : vector<2x32xf32>
    %187 = arith.negf %186 : vector<2x32xf32>
    %188 = math.exp %187 : vector<2x32xf32>
    %cst_139 = arith.constant 1.000000e+00 : f32
    %189 = vector.broadcast %cst_139 : f32 to vector<2x32xf32>
    %190 = arith.addf %189, %188 : vector<2x32xf32>
    %191 = arith.divf %189, %190 : vector<2x32xf32>
    %192 = vector.extract_strided_slice %184 {offsets = [0, 32], sizes = [2, 32], strides = [1, 1]} : vector<2x64xf32> to vector<2x32xf32>
    %193 = arith.addf %176, %192 : vector<2x32xf32>
    %194 = arith.negf %193 : vector<2x32xf32>
    %195 = math.exp %194 : vector<2x32xf32>
    %cst_140 = arith.constant 1.000000e+00 : f32
    %196 = vector.broadcast %cst_140 : f32 to vector<2x32xf32>
    %197 = arith.addf %196, %195 : vector<2x32xf32>
    %198 = arith.divf %196, %197 : vector<2x32xf32>
    %199 = arith.mulf %191, %162 : vector<2x32xf32>
    %cst_141 = arith.constant 1.000000e+00 : f32
    %200 = vector.broadcast %cst_141 : f32 to vector<2x32xf32>
    %201 = arith.subf %200, %191 : vector<2x32xf32>
    %202 = arith.mulf %201, %179 : vector<2x32xf32>
    %203 = arith.addf %199, %202 : vector<2x32xf32>
    %204 = arith.mulf %198, %203 : vector<2x32xf32>
    %cst_142 = arith.constant 1.000000e+00 : f32
    %205 = vector.broadcast %cst_142 : f32 to vector<2x32xf32>
    %206 = arith.subf %205, %198 : vector<2x32xf32>
    %207 = arith.mulf %206, %182 : vector<2x32xf32>
    %208 = arith.addf %204, %207 : vector<2x32xf32>
    %c0_143 = arith.constant 0 : index
    %c4_144 = arith.constant 4 : index
    %c0_145 = arith.constant 0 : index
    %c0_146 = arith.constant 0 : index
    %209 = vector.load %arg6[%c0_143, %c4_144, %c0_145, %c0_146] : memref<1x8x2x32xf32, #tpu.memory_space<vmem>>, vector<1x1x2x32xf32>
    %210 = vector.shape_cast %209 : vector<1x1x2x32xf32> to vector<2x32xf32>
    %211 = vector.shape_cast %208 : vector<2x32xf32> to vector<1x1x2x32xf32>
    tpu.vector_store %arg6[%c0_143, %c4_144, %c0_145, %c0_146], %211 {strides = array<i32>} : memref<1x8x2x32xf32, #tpu.memory_space<vmem>>, vector<1x1x2x32xf32>,
    %c0_147 = arith.constant 0 : index
    %c5 = arith.constant 5 : index
    %c0_148 = arith.constant 0 : index
    %c0_149 = arith.constant 0 : index
    %c0_150 = arith.constant 0 : index
    %212 = vector.load %arg2[%c0_147, %c5, %c0_148, %c0_149, %c0_150] : memref<1x8x4x2x32xbf16, #tpu.memory_space<vmem>>, vector<1x1x1x2x32xbf16>
    %213 = vector.shape_cast %212 : vector<1x1x1x2x32xbf16> to vector<2x32xbf16>
    %214 = arith.extf %213 : vector<2x32xbf16> to vector<2x32xf32>
    %c0_151 = arith.constant 0 : index
    %c5_152 = arith.constant 5 : index
    %c1_153 = arith.constant 1 : index
    %c0_154 = arith.constant 0 : index
    %c0_155 = arith.constant 0 : index
    %215 = vector.load %arg2[%c0_151, %c5_152, %c1_153, %c0_154, %c0_155] : memref<1x8x4x2x32xbf16, #tpu.memory_space<vmem>>, vector<1x1x1x2x32xbf16>
    %216 = vector.shape_cast %215 : vector<1x1x1x2x32xbf16> to vector<2x32xbf16>
    %217 = arith.extf %216 : vector<2x32xbf16> to vector<2x32xf32>
    %c0_156 = arith.constant 0 : index
    %c5_157 = arith.constant 5 : index
    %c2_158 = arith.constant 2 : index
    %c0_159 = arith.constant 0 : index
    %c0_160 = arith.constant 0 : index
    %218 = vector.load %arg2[%c0_156, %c5_157, %c2_158, %c0_159, %c0_160] : memref<1x8x4x2x32xbf16, #tpu.memory_space<vmem>>, vector<1x1x1x2x32xbf16>
    %219 = vector.shape_cast %218 : vector<1x1x1x2x32xbf16> to vector<2x32xbf16>
    %220 = arith.extf %219 : vector<2x32xbf16> to vector<2x32xf32>
    %c0_161 = arith.constant 0 : index
    %c5_162 = arith.constant 5 : index
    %c3_163 = arith.constant 3 : index
    %c0_164 = arith.constant 0 : index
    %c0_165 = arith.constant 0 : index
    %221 = vector.load %arg2[%c0_161, %c5_162, %c3_163, %c0_164, %c0_165] : memref<1x8x4x2x32xbf16, #tpu.memory_space<vmem>>, vector<1x1x1x2x32xbf16>
    %222 = vector.shape_cast %221 : vector<1x1x1x2x32xbf16> to vector<2x32xbf16>
    %223 = arith.extf %222 : vector<2x32xbf16> to vector<2x32xf32>
    %224 = arith.truncf %208 : vector<2x32xf32> to vector<2x32xbf16>
    %cst_166 = arith.constant dense<0.000000e+00> : vector<2x64xf32>
    %225 = tpu.matmul %224, %4, %cst_166 {dimension_numbers = #tpu.dot_dimension_numbers<[1], [0], [0], [1], [0, 0, 1, 1], [], []>} : vector<2x32xbf16>, vector<32x64xbf16>, vector<2x64xf32> -> vector<2x64xf32>
    %226 = vector.extract_strided_slice %225 {offsets = [0, 0], sizes = [2, 32], strides = [1, 1]} : vector<2x64xf32> to vector<2x32xf32>
    %227 = arith.addf %214, %226 : vector<2x32xf32>
    %228 = arith.negf %227 : vector<2x32xf32>
    %229 = math.exp %228 : vector<2x32xf32>
    %cst_167 = arith.constant 1.000000e+00 : f32
    %230 = vector.broadcast %cst_167 : f32 to vector<2x32xf32>
    %231 = arith.addf %230, %229 : vector<2x32xf32>
    %232 = arith.divf %230, %231 : vector<2x32xf32>
    %233 = vector.extract_strided_slice %225 {offsets = [0, 32], sizes = [2, 32], strides = [1, 1]} : vector<2x64xf32> to vector<2x32xf32>
    %234 = arith.addf %217, %233 : vector<2x32xf32>
    %235 = arith.negf %234 : vector<2x32xf32>
    %236 = math.exp %235 : vector<2x32xf32>
    %cst_168 = arith.constant 1.000000e+00 : f32
    %237 = vector.broadcast %cst_168 : f32 to vector<2x32xf32>
    %238 = arith.addf %237, %236 : vector<2x32xf32>
    %239 = arith.divf %237, %238 : vector<2x32xf32>
    %240 = arith.mulf %232, %203 : vector<2x32xf32>
    %cst_169 = arith.constant 1.000000e+00 : f32
    %241 = vector.broadcast %cst_169 : f32 to vector<2x32xf32>
    %242 = arith.subf %241, %232 : vector<2x32xf32>
    %243 = arith.mulf %242, %220 : vector<2x32xf32>
    %244 = arith.addf %240, %243 : vector<2x32xf32>
    %245 = arith.mulf %239, %244 : vector<2x32xf32>
    %cst_170 = arith.constant 1.000000e+00 : f32
    %246 = vector.broadcast %cst_170 : f32 to vector<2x32xf32>
    %247 = arith.subf %246, %239 : vector<2x32xf32>
    %248 = arith.mulf %247, %223 : vector<2x32xf32>
    %249 = arith.addf %245, %248 : vector<2x32xf32>
    %c0_171 = arith.constant 0 : index
    %c5_172 = arith.constant 5 : index
    %c0_173 = arith.constant 0 : index
    %c0_174 = arith.constant 0 : index
    %250 = vector.load %arg6[%c0_171, %c5_172, %c0_173, %c0_174] : memref<1x8x2x32xf32, #tpu.memory_space<vmem>>, vector<1x1x2x32xf32>
    %251 = vector.shape_cast %250 : vector<1x1x2x32xf32> to vector<2x32xf32>
    %252 = vector.shape_cast %249 : vector<2x32xf32> to vector<1x1x2x32xf32>
    tpu.vector_store %arg6[%c0_171, %c5_172, %c0_173, %c0_174], %252 {strides = array<i32>} : memref<1x8x2x32xf32, #tpu.memory_space<vmem>>, vector<1x1x2x32xf32>,
    %c0_175 = arith.constant 0 : index
    %c6 = arith.constant 6 : index
    %c0_176 = arith.constant 0 : index
    %c0_177 = arith.constant 0 : index
    %c0_178 = arith.constant 0 : index
    %253 = vector.load %arg2[%c0_175, %c6, %c0_176, %c0_177, %c0_178] : memref<1x8x4x2x32xbf16, #tpu.memory_space<vmem>>, vector<1x1x1x2x32xbf16>
    %254 = vector.shape_cast %253 : vector<1x1x1x2x32xbf16> to vector<2x32xbf16>
    %255 = arith.extf %254 : vector<2x32xbf16> to vector<2x32xf32>
    %c0_179 = arith.constant 0 : index
    %c6_180 = arith.constant 6 : index
    %c1_181 = arith.constant 1 : index
    %c0_182 = arith.constant 0 : index
    %c0_183 = arith.constant 0 : index
    %256 = vector.load %arg2[%c0_179, %c6_180, %c1_181, %c0_182, %c0_183] : memref<1x8x4x2x32xbf16, #tpu.memory_space<vmem>>, vector<1x1x1x2x32xbf16>
    %257 = vector.shape_cast %256 : vector<1x1x1x2x32xbf16> to vector<2x32xbf16>
    %258 = arith.extf %257 : vector<2x32xbf16> to vector<2x32xf32>
    %c0_184 = arith.constant 0 : index
    %c6_185 = arith.constant 6 : index
    %c2_186 = arith.constant 2 : index
    %c0_187 = arith.constant 0 : index
    %c0_188 = arith.constant 0 : index
    %259 = vector.load %arg2[%c0_184, %c6_185, %c2_186, %c0_187, %c0_188] : memref<1x8x4x2x32xbf16, #tpu.memory_space<vmem>>, vector<1x1x1x2x32xbf16>
    %260 = vector.shape_cast %259 : vector<1x1x1x2x32xbf16> to vector<2x32xbf16>
    %261 = arith.extf %260 : vector<2x32xbf16> to vector<2x32xf32>
    %c0_189 = arith.constant 0 : index
    %c6_190 = arith.constant 6 : index
    %c3_191 = arith.constant 3 : index
    %c0_192 = arith.constant 0 : index
    %c0_193 = arith.constant 0 : index
    %262 = vector.load %arg2[%c0_189, %c6_190, %c3_191, %c0_192, %c0_193] : memref<1x8x4x2x32xbf16, #tpu.memory_space<vmem>>, vector<1x1x1x2x32xbf16>
    %263 = vector.shape_cast %262 : vector<1x1x1x2x32xbf16> to vector<2x32xbf16>
    %264 = arith.extf %263 : vector<2x32xbf16> to vector<2x32xf32>
    %265 = arith.truncf %249 : vector<2x32xf32> to vector<2x32xbf16>
    %cst_194 = arith.constant dense<0.000000e+00> : vector<2x64xf32>
    %266 = tpu.matmul %265, %4, %cst_194 {dimension_numbers = #tpu.dot_dimension_numbers<[1], [0], [0], [1], [0, 0, 1, 1], [], []>} : vector<2x32xbf16>, vector<32x64xbf16>, vector<2x64xf32> -> vector<2x64xf32>
    %267 = vector.extract_strided_slice %266 {offsets = [0, 0], sizes = [2, 32], strides = [1, 1]} : vector<2x64xf32> to vector<2x32xf32>
    %268 = arith.addf %255, %267 : vector<2x32xf32>
    %269 = arith.negf %268 : vector<2x32xf32>
    %270 = math.exp %269 : vector<2x32xf32>
    %cst_195 = arith.constant 1.000000e+00 : f32
    %271 = vector.broadcast %cst_195 : f32 to vector<2x32xf32>
    %272 = arith.addf %271, %270 : vector<2x32xf32>
    %273 = arith.divf %271, %272 : vector<2x32xf32>
    %274 = vector.extract_strided_slice %266 {offsets = [0, 32], sizes = [2, 32], strides = [1, 1]} : vector<2x64xf32> to vector<2x32xf32>
    %275 = arith.addf %258, %274 : vector<2x32xf32>
    %276 = arith.negf %275 : vector<2x32xf32>
    %277 = math.exp %276 : vector<2x32xf32>
    %cst_196 = arith.constant 1.000000e+00 : f32
    %278 = vector.broadcast %cst_196 : f32 to vector<2x32xf32>
    %279 = arith.addf %278, %277 : vector<2x32xf32>
    %280 = arith.divf %278, %279 : vector<2x32xf32>
    %281 = arith.mulf %273, %244 : vector<2x32xf32>
    %cst_197 = arith.constant 1.000000e+00 : f32
    %282 = vector.broadcast %cst_197 : f32 to vector<2x32xf32>
    %283 = arith.subf %282, %273 : vector<2x32xf32>
    %284 = arith.mulf %283, %261 : vector<2x32xf32>
    %285 = arith.addf %281, %284 : vector<2x32xf32>
    %286 = arith.mulf %280, %285 : vector<2x32xf32>
    %cst_198 = arith.constant 1.000000e+00 : f32
    %287 = vector.broadcast %cst_198 : f32 to vector<2x32xf32>
    %288 = arith.subf %287, %280 : vector<2x32xf32>
    %289 = arith.mulf %288, %264 : vector<2x32xf32>
    %290 = arith.addf %286, %289 : vector<2x32xf32>
    %c0_199 = arith.constant 0 : index
    %c6_200 = arith.constant 6 : index
    %c0_201 = arith.constant 0 : index
    %c0_202 = arith.constant 0 : index
    %291 = vector.load %arg6[%c0_199, %c6_200, %c0_201, %c0_202] : memref<1x8x2x32xf32, #tpu.memory_space<vmem>>, vector<1x1x2x32xf32>
    %292 = vector.shape_cast %291 : vector<1x1x2x32xf32> to vector<2x32xf32>
    %293 = vector.shape_cast %290 : vector<2x32xf32> to vector<1x1x2x32xf32>
    tpu.vector_store %arg6[%c0_199, %c6_200, %c0_201, %c0_202], %293 {strides = array<i32>} : memref<1x8x2x32xf32, #tpu.memory_space<vmem>>, vector<1x1x2x32xf32>,
    %c0_203 = arith.constant 0 : index
    %c7 = arith.constant 7 : index
    %c0_204 = arith.constant 0 : index
    %c0_205 = arith.constant 0 : index
    %c0_206 = arith.constant 0 : index
    %294 = vector.load %arg2[%c0_203, %c7, %c0_204, %c0_205, %c0_206] : memref<1x8x4x2x32xbf16, #tpu.memory_space<vmem>>, vector<1x1x1x2x32xbf16>
    %295 = vector.shape_cast %294 : vector<1x1x1x2x32xbf16> to vector<2x32xbf16>
    %296 = arith.extf %295 : vector<2x32xbf16> to vector<2x32xf32>
    %c0_207 = arith.constant 0 : index
    %c7_208 = arith.constant 7 : index
    %c1_209 = arith.constant 1 : index
    %c0_210 = arith.constant 0 : index
    %c0_211 = arith.constant 0 : index
    %297 = vector.load %arg2[%c0_207, %c7_208, %c1_209, %c0_210, %c0_211] : memref<1x8x4x2x32xbf16, #tpu.memory_space<vmem>>, vector<1x1x1x2x32xbf16>
    %298 = vector.shape_cast %297 : vector<1x1x1x2x32xbf16> to vector<2x32xbf16>
    %299 = arith.extf %298 : vector<2x32xbf16> to vector<2x32xf32>
    %c0_212 = arith.constant 0 : index
    %c7_213 = arith.constant 7 : index
    %c2_214 = arith.constant 2 : index
    %c0_215 = arith.constant 0 : index
    %c0_216 = arith.constant 0 : index
    %300 = vector.load %arg2[%c0_212, %c7_213, %c2_214, %c0_215, %c0_216] : memref<1x8x4x2x32xbf16, #tpu.memory_space<vmem>>, vector<1x1x1x2x32xbf16>
    %301 = vector.shape_cast %300 : vector<1x1x1x2x32xbf16> to vector<2x32xbf16>
    %302 = arith.extf %301 : vector<2x32xbf16> to vector<2x32xf32>
    %c0_217 = arith.constant 0 : index
    %c7_218 = arith.constant 7 : index
    %c3_219 = arith.constant 3 : index
    %c0_220 = arith.constant 0 : index
    %c0_221 = arith.constant 0 : index
    %303 = vector.load %arg2[%c0_217, %c7_218, %c3_219, %c0_220, %c0_221] : memref<1x8x4x2x32xbf16, #tpu.memory_space<vmem>>, vector<1x1x1x2x32xbf16>
    %304 = vector.shape_cast %303 : vector<1x1x1x2x32xbf16> to vector<2x32xbf16>
    %305 = arith.extf %304 : vector<2x32xbf16> to vector<2x32xf32>
    %306 = arith.truncf %290 : vector<2x32xf32> to vector<2x32xbf16>
    %cst_222 = arith.constant dense<0.000000e+00> : vector<2x64xf32>
    %307 = tpu.matmul %306, %4, %cst_222 {dimension_numbers = #tpu.dot_dimension_numbers<[1], [0], [0], [1], [0, 0, 1, 1], [], []>} : vector<2x32xbf16>, vector<32x64xbf16>, vector<2x64xf32> -> vector<2x64xf32>
    %308 = vector.extract_strided_slice %307 {offsets = [0, 0], sizes = [2, 32], strides = [1, 1]} : vector<2x64xf32> to vector<2x32xf32>
    %309 = arith.addf %296, %308 : vector<2x32xf32>
    %310 = arith.negf %309 : vector<2x32xf32>
    %311 = math.exp %310 : vector<2x32xf32>
    %cst_223 = arith.constant 1.000000e+00 : f32
    %312 = vector.broadcast %cst_223 : f32 to vector<2x32xf32>
    %313 = arith.addf %312, %311 : vector<2x32xf32>
    %314 = arith.divf %312, %313 : vector<2x32xf32>
    %315 = vector.extract_strided_slice %307 {offsets = [0, 32], sizes = [2, 32], strides = [1, 1]} : vector<2x64xf32> to vector<2x32xf32>
    %316 = arith.addf %299, %315 : vector<2x32xf32>
    %317 = arith.negf %316 : vector<2x32xf32>
    %318 = math.exp %317 : vector<2x32xf32>
    %cst_224 = arith.constant 1.000000e+00 : f32
    %319 = vector.broadcast %cst_224 : f32 to vector<2x32xf32>
    %320 = arith.addf %319, %318 : vector<2x32xf32>
    %321 = arith.divf %319, %320 : vector<2x32xf32>
    %322 = arith.mulf %314, %285 : vector<2x32xf32>
    %cst_225 = arith.constant 1.000000e+00 : f32
    %323 = vector.broadcast %cst_225 : f32 to vector<2x32xf32>
    %324 = arith.subf %323, %314 : vector<2x32xf32>
    %325 = arith.mulf %324, %302 : vector<2x32xf32>
    %326 = arith.addf %322, %325 : vector<2x32xf32>
    %327 = arith.mulf %321, %326 : vector<2x32xf32>
    %cst_226 = arith.constant 1.000000e+00 : f32
    %328 = vector.broadcast %cst_226 : f32 to vector<2x32xf32>
    %329 = arith.subf %328, %321 : vector<2x32xf32>
    %330 = arith.mulf %329, %305 : vector<2x32xf32>
    %331 = arith.addf %327, %330 : vector<2x32xf32>
    %c0_227 = arith.constant 0 : index
    %c7_228 = arith.constant 7 : index
    %c0_229 = arith.constant 0 : index
    %c0_230 = arith.constant 0 : index
    %332 = vector.load %arg6[%c0_227, %c7_228, %c0_229, %c0_230] : memref<1x8x2x32xf32, #tpu.memory_space<vmem>>, vector<1x1x2x32xf32>
    %333 = vector.shape_cast %332 : vector<1x1x2x32xf32> to vector<2x32xf32>
    %334 = vector.shape_cast %331 : vector<2x32xf32> to vector<1x1x2x32xf32>
    tpu.vector_store %arg6[%c0_227, %c7_228, %c0_229, %c0_230], %334 {strides = array<i32>} : memref<1x8x2x32xf32, #tpu.memory_space<vmem>>, vector<1x1x2x32xf32>,
    %c0_231 = arith.constant 0 : index
    %c0_232 = arith.constant 0 : index
    %335 = vector.load %arg9[%c0_231, %c0_232] : memref<2x32xf32, #tpu.memory_space<vmem>>, vector<2x32xf32>
    tpu.vector_store %arg9[%c0_231, %c0_232], %331 {strides = array<i32>} : memref<2x32xf32, #tpu.memory_space<vmem>>, vector<2x32xf32>,
    %c0_233 = arith.constant 0 : index
    %c0_234 = arith.constant 0 : index
    %336 = vector.load %arg10[%c0_233, %c0_234] : memref<2x32xf32, #tpu.memory_space<vmem>>, vector<2x32xf32>
    tpu.vector_store %arg10[%c0_233, %c0_234], %326 {strides = array<i32>} : memref<2x32xf32, #tpu.memory_space<vmem>>, vector<2x32xf32>,
    %c0_i32_235 = arith.constant 0 : i32
    %337 = arith.cmpi eq, %arg1, %c0_i32_235 : i32
    %338 = arith.extui %337 : i1 to i32
    %c0_i32_236 = arith.constant 0 : i32
    %339 = arith.cmpi ne, %338, %c0_i32_236 : i32
    scf.if %339 {
      %c0_237 = arith.constant 0 : index
      %c0_238 = arith.constant 0 : index
      %c0_239 = arith.constant 0 : index
      %340 = vector.load %arg7[%c0_237, %c0_238, %c0_239] : memref<1x2x32xf32, #tpu.memory_space<vmem>>, vector<1x2x32xf32>
      %341 = vector.shape_cast %340 : vector<1x2x32xf32> to vector<2x32xf32>
      %342 = vector.shape_cast %331 : vector<2x32xf32> to vector<1x2x32xf32>
      tpu.vector_store %arg7[%c0_237, %c0_238, %c0_239], %342 {strides = array<i32>} : memref<1x2x32xf32, #tpu.memory_space<vmem>>, vector<1x2x32xf32>,
      %c0_240 = arith.constant 0 : index
      %c0_241 = arith.constant 0 : index
      %c0_242 = arith.constant 0 : index
      %343 = vector.load %arg8[%c0_240, %c0_241, %c0_242] : memref<1x2x32xf32, #tpu.memory_space<vmem>>, vector<1x2x32xf32>
      %344 = vector.shape_cast %343 : vector<1x2x32xf32> to vector<2x32xf32>
      %345 = vector.shape_cast %326 : vector<2x32xf32> to vector<1x2x32xf32>
      tpu.vector_store %arg8[%c0_240, %c0_241, %c0_242], %345 {strides = array<i32>} : memref<1x2x32xf32, #tpu.memory_space<vmem>>, vector<1x2x32xf32>,
    } else {
    }
    return
  }
  func.func @transform_0(%arg0: i32, %arg1: i32) -> (i32, i32, i32, i32, i32) {
    %c0_i32 = arith.constant 0 : i32
    %c0_i32_0 = arith.constant 0 : i32
    %c0_i32_1 = arith.constant 0 : i32
    %c0_i32_2 = arith.constant 0 : i32
    return %arg0, %arg1, %c0_i32, %c0_i32_0, %c0_i32_1 : i32, i32, i32, i32, i32
  }
  func.func @transform_1(%arg0: i32, %arg1: i32) -> (i32, i32, i32) {
    %c0_i32 = arith.constant 0 : i32
    %c0_i32_0 = arith.constant 0 : i32
    %c0_i32_1 = arith.constant 0 : i32
    return %arg0, %c0_i32, %c0_i32_0 : i32, i32, i32
  }
  func.func @transform_2(%arg0: i32, %arg1: i32) -> (i32, i32, i32) {
    %c0_i32 = arith.constant 0 : i32
    %c0_i32_0 = arith.constant 0 : i32
    %c0_i32_1 = arith.constant 0 : i32
    return %arg0, %c0_i32, %c0_i32_0 : i32, i32, i32
  }
  func.func @transform_3(%arg0: i32, %arg1: i32) -> (i32, i32, i32) {
    %c0_i32 = arith.constant 0 : i32
    %c0_i32_0 = arith.constant 0 : i32
    %c0_i32_1 = arith.constant 0 : i32
    return %arg0, %c0_i32, %c0_i32_0 : i32, i32, i32
  }
  func.func @transform_4(%arg0: i32, %arg1: i32) -> (i32, i32, i32, i32) {
    %c0_i32 = arith.constant 0 : i32
    %c0_i32_0 = arith.constant 0 : i32
    %c0_i32_1 = arith.constant 0 : i32
    return %arg0, %arg1, %c0_i32, %c0_i32_0 : i32, i32, i32, i32
  }
  func.func @transform_5(%arg0: i32, %arg1: i32) -> (i32, i32, i32) {
    %c0_i32 = arith.constant 0 : i32
    %c0_i32_0 = arith.constant 0 : i32
    %c0_i32_1 = arith.constant 0 : i32
    return %arg0, %c0_i32, %c0_i32_0 : i32, i32, i32
  }
  func.func @transform_6(%arg0: i32, %arg1: i32) -> (i32, i32, i32) {
    %c0_i32 = arith.constant 0 : i32
    %c0_i32_0 = arith.constant 0 : i32
    %c0_i32_1 = arith.constant 0 : i32
    return %arg0, %c0_i32, %c0_i32_0 : i32, i32, i32
  }
}

</mosaic_0001>

<bundles_post_ra>
// kernel: bidir_regu_layer_pallas.1
= control target key start
LH: loop header
LB: loop body
LE: loop exit
PB: predicated region body
PF: predicated region fallthrough
CT: control target
= control target key end

     0   :  { %s1641_s21 = smov 0   ;;  %s1643_s22 = smov 0   ;;  %s1840_s0 = inlined_call_operand.vmem [shape: bf16[2,8,4,2,32], index: 0, kind: input, shape index: {}]   ;;  %s1841_s1 = inlined_call_operand.vmem [shape: bf16[2,32,64], index: 1, kind: input, shape index: {}]   ;;  %s1842_s2 = inlined_call_operand.vmem [shape: f32[2,2,32], index: 2, kind: input, shape index: {}]   ;;  %s1843_s3 = inlined_call_operand.vmem [shape: f32[2,2,32], index: 3, kind: input, shape index: {}]   ;;  %s1844_s4 = inlined_call_operand.vmem [shape: f32[2,8,2,32], index: 4, kind: output, shape index: {0}]   ;;  %s1845_s5 = inlined_call_operand.vmem [shape: f32[2,2,32], index: 5, kind: output, shape index: {1}]   ;;  %s1846_s6 = inlined_call_operand.vmem [shape: f32[2,2,32], index: 6, kind: output, shape index: {2}]  }
   0x1   :  { %s1645_s23 = smov 0  }
   0x2 LB: > { %s29_s24 = sadd.s32 1, %s1596_s22  ;;  %p1318_p0 = scmp.ge.s32.totalorder %s1600_s23, 1  ;;  %s1600_s23 = sphi %s1645_s23, %s17_s23   ;;  %s1596_s22 = sphi %s1643_s22, %s1848_s22   ;;  %s1592_s21 = sphi %s1641_s21, %s1847_s21  }
   0x3   : > { %p31_p1 = scmp.ge.s32.totalorder %s29_s24, 2  ;;  %p266_p2 = scmp.lt.s32.totalorder %s1600_s23, 3 }
   0x5   : > { %s1850_s24 = smov (%p31_p1, %s29_s24), 0  ;;  %p267_p3 = pnand %p1318_p0, %p266_p2 }
   0x6   : > { %p326_p4 = scmp.lt.s32.totalorder (!%p267_p3), %s1592_s21, 1  ;;  %s1605_s12 = smov (!%p267_p3), 96  }
   0x7   : > { %270 = sbr.rel (%p267_p3) target bundleno = 2843 (0xb1b), region = 36 }
   0xc   : > { %v1602_v0 = vmov 0.0   ;;  %vm1603_vm0 = vmmov 0   ;;  %s1852_s21 = smov (!%p326_p4, %s1592_s21), 1  ;;  %vm372_vm1 = vcmask 254976   ;;  %vm406_vm2 = vcmask 261120  }
   0xd   : > { %1420 = vmatprep.subr.bf16.mxu0 %v1602_v0  ;;  %1424 = vmatprep.mubr.msk.bf16.mxu0 %vm1603_vm0, %v1602_v0  ;;  %s1394_s25 = sshll.u32 %s1852_s21, 4  ;;  %s1676_s29 = sshll.u32 %s1852_s21, 1  ;;  %v1604_v7 = vmov 1983009808   ;;  %v461_v9 = vlaneseq }
   0xe   : > { %1428 = vmatprep.subr.bf16.mxu1 %v1602_v0  ;;  %1432 = vmatprep.mubr.msk.bf16.mxu1 %vm1603_vm0, %v1602_v0  ;;  %s339_s28 = scalar_lea.vmem %s1841_s1, %s1394_s25  ;;  %s343_s8 = scalar_lea.vmem %s1842_s2, %s1676_s29  ;;  %v459_v8 = vunpack.c.l.s4 %v1604_v7 }
   0xf   : > { %v1673_v1 = vld [vmem:[%s339_s28 + $0x8] sm:$0xff]   ;;  %v1683_v2 = vld [vmem:[%s339_s28] sm:$0xff]   ;;  %s347_s11 = scalar_lea.vmem %s1843_s3, %s1676_s29  ;;  %v462_v11 = vshrl.u32 %v461_v9, 7  ;;  %s1319_s13 = sshll.u32 %s1852_s21, 5 }
  0x10   : > { %1421 = vmatpush3.bf16.msra.mxu0 %v1673_v1  ;;  %v371_v3 = vld [vmem:[%s343_s8] sm:$0x3]  ;;  %1429 = vmatpush3.bf16.msra.mxu1 %v1673_v1  ;;  %v460_v10 = vunpack.c.0.s8 %v459_v8  ;;  %s1713_s16 = scalar_lea.vmem %s1840_s0, %s1319_s13  ;;  %s1724_s19 = scalar_lea.vmem %s1844_s4, %s1394_s25 }
  0x11   : > { %1422 = vmatprep.subr.bf16.mxu0 %v1602_v0  ;;  %373 = vst.msk [vmem:[#allocation2] sm:$0x3] %vm372_vm1, %v371_v3  ;;  %1430 = vmatprep.subr.bf16.mxu1 %v1602_v0  ;;  %v374_v6 = vld [vmem:[%s347_s11] sm:$0x3]  ;;  %v1329_v32 = vld [vmem:[%s1713_s16 + $0x2] sm:$0x1]  ;;  %s365_s25 = scalar_lea.vmem %s1846_s6, %s1676_s29  ;;  %s361_s28 = scalar_lea.vmem %s1845_s5, %s1676_s29 }
  0x12   : > { %375 = vst.msk [vmem:[#allocation3] sm:$0x3] %vm372_vm1, %v374_v6  ;;  %v1705_v12 = vsub.s32 %v460_v10, %v462_v11  ;;  %v382_v18 = vld [vmem:[%s1713_s16] sm:$0x1]  ;;  %v1328_v22 = vld [vmem:[%s1713_s16 + $0x1] sm:$0x1]  ;;  %v389_v33 = vunpack.c.l.bf16 %v1329_v32 }
  0x13   : > { %v383_v19 = vunpack.c.l.bf16 %v382_v18  ;;  %v386_v23 = vunpack.c.l.bf16 %v1328_v22  ;;  %v1330_v36 = vld [vmem:[%s1713_s16 + $0x3] sm:$0x1]  ;;  %v1336_v52 = vld [vmem:[%s1713_s16 + $0x4] sm:$0x1]  ;;  %v1337_v56 = vld [vmem:[%s1713_s16 + $0x5] sm:$0x1] }
  0x14   : > { %1423 = vmatpush3.bf16.msra.mxu0 %v1683_v2  ;;  %1431 = vmatpush3.bf16.msra.mxu1 %v1683_v2  ;;  %v392_v38 = vunpack.c.l.bf16 %v1330_v36  ;;  %v487_v53 = vunpack.c.l.bf16 %v1336_v52  ;;  %v490_v57 = vunpack.c.l.bf16 %v1337_v56  ;;  %v1339_v8 = vld [vmem:[%s1713_s16 + $0x7] sm:$0x1] }
  0x15   : > { %1436 = vmatprep.subr.bf16.mxu0 %v1602_v0  ;;  %1444 = vmatprep.subr.bf16.mxu1 %v1602_v0  ;;  %v496_v10 = vunpack.c.l.bf16 %v1339_v8 }
  0x18   : > { %v380_v4 = vld [vmem:[#allocation2] sm:$0x3] }
  0x19   : > { %v393_v5 = vpack.c.bf16 %v380_v4, %v380_v4  ;;  %v381_v35 = vld [vmem:[#allocation3] sm:$0x3] }
  0x1b   : > { %1425 = vmatmul.mubr.msk.bf16.vlgmr.msra.gmra.mxu0 %vm406_vm2, %v393_v5  ;;  %v1338_v5 = vld [vmem:[%s1713_s16 + $0x6] sm:$0x1] }
  0x1c   : > { %1437 = vmatpush3.bf16.msra.mxu0 %v1673_v1  ;;  %1440 = vmatprep.mubr.msk.bf16.mxu0 %vm1603_vm0, %v1602_v0  ;;  %v493_v7 = vunpack.c.l.bf16 %v1338_v5 }
  0x1d   : > { %1438 = vmatprep.subr.bf16.mxu0 %v1602_v0 }
  0x20   : > { %1439 = vmatpush3.bf16.msra.mxu0 %v1683_v2 }
  0x21   : > { %1452 = vmatprep.subr.bf16.mxu0 %v1602_v0 }
  0xdb   : > { %v444_v13 = vpop.f32.mrf.mxu0 }
  0xdc   : > { %v464_v14 = vrot.slane %v444_v13, %v1705_v12  ;;  %v450_v20 = vadd.f32 %v444_v13, %v383_v19 }
  0xdd   : > { %v1426_v15 = vpop.f32.mrf.mxu0 }
  0xde   : > { %465 = vrot.lane.b32.xlu0 %v464_v14, %s1605_s12  ;;  %v1334_v21 = vmul.f32 -1.442695, %v450_v20 }
  0xdf   : > { %v447_v16 = vpop.f32.mrf.mxu0 }
  0xe0   : > { %1514 = vpow2.f32 %v1334_v21 }
  0xe1   : > { %v1427_v17 = vpop.f32.mrf.mxu0 }
  0xed   : > { %v1515_v27 = vpop.eup %1514 }
  0xee   : > { %v454_v28 = vadd.f32 1.0, %v1515_v27 }
 0x150   : > { %v466_v24 = vpop.permute.xlu0 %465 }
 0x151   : > { %v468_v25 = vadd.f32 %v466_v24, %v386_v23 }
 0x153   : > { %v1335_v26 = vmul.f32 -1.442695, %v468_v25  ;;  %v1344_v25 = vld [vmem:[%s1713_s16 + $0x8] sm:$0x1] }
 0x155   : > { %1516 = vpow2.f32 %v1335_v26  ;;  %v578_v26 = vunpack.c.l.bf16 %v1344_v25 }
 0x156   : > { %1518 = vrcp.f32 %v454_v28 }
 0x162   : > { %v1517_v29 = vpop.eup %1516 }
 0x163   : > { %v472_v30 = vadd.f32 1.0, %v1517_v29  ;;  %v1519_v31 = vpop.eup %1518  ;;  %v1345_v29 = vld [vmem:[%s1713_s16 + $0x9] sm:$0x1] }
 0x164   : > { %v476_v34 = vsub.f32 1.0, %v1519_v31  ;;  %v475_v39 = vmul.f32 %v1519_v31, %v381_v35 }
 0x165   : > { %1520 = vrcp.f32 %v472_v30  ;;  %v581_v30 = vunpack.c.l.bf16 %v1345_v29 }
 0x166   : > { %v477_v37 = vmul.f32 %v476_v34, %v389_v33 }
 0x168   : > { %v478_v41 = vadd.f32 %v477_v37, %v475_v39  ;;  %v1346_v39 = vld [vmem:[%s1713_s16 + $0xa] sm:$0x1] }
 0x172   : > { %v1521_v40 = vpop.eup %1520 }
 0x173   : > { %v480_v42 = vsub.f32 1.0, %v1521_v40  ;;  %v479_v43 = vmul.f32 %v1521_v40, %v478_v41 }
 0x175   : > { %v481_v44 = vmul.f32 %v480_v42, %v392_v38  ;;  %v1347_v42 = vld [vmem:[%s1713_s16 + $0xb] sm:$0x1] }
 0x177   : > { %v482_v45 = vadd.f32 %v481_v44, %v479_v43  ;;  %v587_v44 = vunpack.c.l.bf16 %v1347_v42 }
 0x179   : > { %484 = vst.msk [vmem:[%s1724_s19] sm:$0x3] %vm372_vm1, %v482_v45  ;;  %v497_v46 = vpack.c.bf16 %v482_v45, %v482_v45 }
 0x17b   : > { %1433 = vmatmul.mubr.msk.bf16.vlgmr.msra.gmra.mxu1 %vm406_vm2, %v497_v46 }
 0x17c   : > { %1445 = vmatpush3.bf16.msra.mxu1 %v1673_v1  ;;  %1448 = vmatprep.mubr.msk.bf16.mxu1 %vm1603_vm0, %v1602_v0 }
 0x17d   : > { %1446 = vmatprep.subr.bf16.mxu1 %v1602_v0 }
 0x180   : > { %1447 = vmatpush3.bf16.msra.mxu1 %v1683_v2 }
 0x181   : > { %1460 = vmatprep.subr.bf16.mxu1 %v1602_v0 }
 0x23b   : > { %v535_v47 = vpop.f32.mrf.mxu1 }
 0x23c   : > { %v555_v48 = vrot.slane %v535_v47, %v1705_v12  ;;  %v541_v54 = vadd.f32 %v535_v47, %v487_v53 }
 0x23d   : > { %v1434_v49 = vpop.f32.mrf.mxu1 }
 0x23e   : > { %556 = vrot.lane.b32.xlu0 %v555_v48, %s1605_s12  ;;  %v1341_v55 = vmul.f32 -1.442695, %v541_v54 }
 0x23f   : > { %v538_v50 = vpop.f32.mrf.mxu1 }
 0x240   : > { %1522 = vpow2.f32 %v1341_v55 }
 0x241   : > { %v1435_v51 = vpop.f32.mrf.mxu1 }
 0x24d   : > { %v1523_v61 = vpop.eup %1522 }
 0x24e   : > { %v545_v62 = vadd.f32 1.0, %v1523_v61 }
 0x2b0   : > { %v557_v58 = vpop.permute.xlu0 %556 }
 0x2b1   : > { %v559_v59 = vadd.f32 %v557_v58, %v490_v57  ;;  %v1352_v58 = vld [vmem:[%s1713_s16 + $0xc] sm:$0x1] }
 0x2b3   : > { %v1342_v60 = vmul.f32 -1.442695, %v559_v59  ;;  %v669_v59 = vunpack.c.l.bf16 %v1352_v58 }
 0x2b5   : > { %1524 = vpow2.f32 %v1342_v60 }
 0x2b6   : > { %1526 = vrcp.f32 %v545_v62  ;;  %v1353_v62 = vld [vmem:[%s1713_s16 + $0xd] sm:$0x1] }
 0x2c2   : > { %v1525_v63 = vpop.eup %1524 }
 0x2c3   : > { %v563_v3 = vadd.f32 1.0, %v1525_v63  ;;  %v1527_v4 = vpop.eup %1526  ;;  %v672_v63 = vunpack.c.l.bf16 %v1353_v62 }
 0x2c4   : > { %v567_v6 = vsub.f32 1.0, %v1527_v4  ;;  %v566_v11 = vmul.f32 %v1527_v4, %v478_v41  ;;  %v584_v41 = vunpack.c.l.bf16 %v1346_v39 }
 0x2c5   : > { %1528 = vrcp.f32 %v563_v3 }
 0x2c6   : > { %v568_v9 = vmul.f32 %v567_v6, %v493_v7 }
 0x2c8   : > { %v569_v14 = vadd.f32 %v568_v9, %v566_v11  ;;  %v1354_v11 = vld [vmem:[%s1713_s16 + $0xe] sm:$0x1] }
 0x2d2   : > { %v1529_v13 = vpop.eup %1528 }
 0x2d3   : > { %v571_v15 = vsub.f32 1.0, %v1529_v13  ;;  %v570_v16 = vmul.f32 %v1529_v13, %v569_v14 }
 0x2d5   : > { %v572_v17 = vmul.f32 %v571_v15, %v496_v10  ;;  %v1355_v15 = vld [vmem:[%s1713_s16 + $0xf] sm:$0x1] }
 0x2d7   : > { %v573_v18 = vadd.f32 %v572_v17, %v570_v16  ;;  %v678_v17 = vunpack.c.l.bf16 %v1355_v15  ;;  %v1370_v15 = vld [vmem:[%s1713_s16 + $0x16] sm:$0x1] }
 0x2d9   : > { %1343 = vst.msk [vmem:[%s1724_s19 + $0x2] sm:$0x3] %vm372_vm1, %v573_v18  ;;  %v588_v19 = vpack.c.bf16 %v573_v18, %v573_v18 }
 0x2db   : > { %1441 = vmatmul.mubr.msk.bf16.vlgmr.msra.gmra.mxu0 %vm406_vm2, %v588_v19 }
 0x2dc   : > { %1453 = vmatpush3.bf16.msra.mxu0 %v1673_v1  ;;  %1456 = vmatprep.mubr.msk.bf16.mxu0 %vm1603_vm0, %v1602_v0 }
 0x2dd   : > { %1454 = vmatprep.subr.bf16.mxu0 %v1602_v0 }
 0x2e0   : > { %1455 = vmatpush3.bf16.msra.mxu0 %v1683_v2 }
 0x2e1   : > { %1468 = vmatprep.subr.bf16.mxu0 %v1602_v0 }
 0x39b   : > { %v626_v20 = vpop.f32.mrf.mxu0 }
 0x39c   : > { %v646_v21 = vrot.slane %v626_v20, %v1705_v12  ;;  %v632_v27 = vadd.f32 %v626_v20, %v578_v26 }
 0x39d   : > { %v1442_v22 = vpop.f32.mrf.mxu0 }
 0x39e   : > { %647 = vrot.lane.b32.xlu1 %v646_v21, %s1605_s12  ;;  %v1349_v28 = vmul.f32 -1.442695, %v632_v27 }
 0x39f   : > { %v629_v23 = vpop.f32.mrf.mxu0 }
 0x3a0   : > { %1530 = vpow2.f32 %v1349_v28 }
 0x3a1   : > { %v1443_v24 = vpop.f32.mrf.mxu0 }
 0x3ad   : > { %v1531_v34 = vpop.eup %1530 }
 0x3ae   : > { %v636_v35 = vadd.f32 1.0, %v1531_v34 }
 0x410   : > { %v648_v31 = vpop.permute.xlu1 %647 }
 0x411   : > { %v650_v32 = vadd.f32 %v648_v31, %v581_v30  ;;  %v1360_v31 = vld [vmem:[%s1713_s16 + $0x10] sm:$0x1] }
 0x413   : > { %v1350_v33 = vmul.f32 -1.442695, %v650_v32  ;;  %v760_v32 = vunpack.c.l.bf16 %v1360_v31 }
 0x415   : > { %1532 = vpow2.f32 %v1350_v33 }
 0x416   : > { %1534 = vrcp.f32 %v636_v35  ;;  %v1361_v35 = vld [vmem:[%s1713_s16 + $0x11] sm:$0x1] }
 0x422   : > { %v1533_v36 = vpop.eup %1532 }
 0x423   : > { %v654_v37 = vadd.f32 1.0, %v1533_v36  ;;  %v1535_v38 = vpop.eup %1534  ;;  %v763_v36 = vunpack.c.l.bf16 %v1361_v35 }
 0x424   : > { %v658_v40 = vsub.f32 1.0, %v1535_v38  ;;  %v657_v45 = vmul.f32 %v1535_v38, %v569_v14  ;;  %v675_v14 = vunpack.c.l.bf16 %v1354_v11 }
 0x425   : > { %1536 = vrcp.f32 %v654_v37 }
 0x426   : > { %v659_v43 = vmul.f32 %v658_v40, %v584_v41 }
 0x428   : > { %v660_v47 = vadd.f32 %v659_v43, %v657_v45  ;;  %v1362_v45 = vld [vmem:[%s1713_s16 + $0x12] sm:$0x1] }
 0x432   : > { %v1537_v46 = vpop.eup %1536 }
 0x433   : > { %v662_v48 = vsub.f32 1.0, %v1537_v46  ;;  %v661_v49 = vmul.f32 %v1537_v46, %v660_v47 }
 0x435   : > { %v663_v50 = vmul.f32 %v662_v48, %v587_v44  ;;  %v1363_v48 = vld [vmem:[%s1713_s16 + $0x13] sm:$0x1] }
 0x437   : > { %v664_v51 = vadd.f32 %v663_v50, %v661_v49  ;;  %v769_v50 = vunpack.c.l.bf16 %v1363_v48  ;;  %v1378_v48 = vld [vmem:[%s1713_s16 + $0x1a] sm:$0x1] }
 0x439   : > { %1351 = vst.msk [vmem:[%s1724_s19 + $0x4] sm:$0x3] %vm372_vm1, %v664_v51  ;;  %v679_v52 = vpack.c.bf16 %v664_v51, %v664_v51 }
 0x43b   : > { %1449 = vmatmul.mubr.msk.bf16.vlgmr.msra.gmra.mxu1 %vm406_vm2, %v679_v52 }
 0x43c   : > { %1461 = vmatpush3.bf16.msra.mxu1 %v1673_v1  ;;  %1464 = vmatprep.mubr.msk.bf16.mxu1 %vm1603_vm0, %v1602_v0 }
 0x43d   : > { %1462 = vmatprep.subr.bf16.mxu1 %v1602_v0 }
 0x440   : > { %1463 = vmatpush3.bf16.msra.mxu1 %v1683_v2 }
 0x441   : > { %1476 = vmatprep.subr.bf16.mxu1 %v1602_v0 }
 0x4fb   : > { %v717_v53 = vpop.f32.mrf.mxu1 }
 0x4fc   : > { %v737_v54 = vrot.slane %v717_v53, %v1705_v12  ;;  %v723_v60 = vadd.f32 %v717_v53, %v669_v59 }
 0x4fd   : > { %v1450_v55 = vpop.f32.mrf.mxu1 }
 0x4fe   : > { %738 = vrot.lane.b32.xlu1 %v737_v54, %s1605_s12  ;;  %v1357_v61 = vmul.f32 -1.442695, %v723_v60 }
 0x4ff   : > { %v720_v56 = vpop.f32.mrf.mxu1 }
 0x500   : > { %1538 = vpow2.f32 %v1357_v61 }
 0x501   : > { %v1451_v57 = vpop.f32.mrf.mxu1 }
 0x50d   : > { %v1539_v6 = vpop.eup %1538 }
 0x50e   : > { %v727_v7 = vadd.f32 1.0, %v1539_v6  ;;  %v1369_v6 = vld [vmem:[%s1713_s16 + $0x15] sm:$0x1] }
 0x570   : > { %v739_v3 = vpop.permute.xlu1 %738 }
 0x571   : > { %v741_v4 = vadd.f32 %v739_v3, %v672_v63  ;;  %v1368_v3 = vld [vmem:[%s1713_s16 + $0x14] sm:$0x1] }
 0x573   : > { %v1358_v5 = vmul.f32 -1.442695, %v741_v4  ;;  %v851_v4 = vunpack.c.l.bf16 %v1368_v3 }
 0x575   : > { %1540 = vpow2.f32 %v1358_v5 }
 0x576   : > { %1542 = vrcp.f32 %v727_v7  ;;  %v854_v7 = vunpack.c.l.bf16 %v1369_v6 }
 0x582   : > { %v1541_v8 = vpop.eup %1540 }
 0x583   : > { %v745_v9 = vadd.f32 1.0, %v1541_v8  ;;  %v1543_v10 = vpop.eup %1542 }
 0x584   : > { %v749_v13 = vsub.f32 1.0, %v1543_v10  ;;  %v748_v18 = vmul.f32 %v1543_v10, %v660_v47  ;;  %v766_v47 = vunpack.c.l.bf16 %v1362_v45 }
 0x585   : > { %1544 = vrcp.f32 %v745_v9 }
 0x586   : > { %v750_v16 = vmul.f32 %v749_v13, %v675_v14 }
 0x588   : > { %v751_v20 = vadd.f32 %v750_v16, %v748_v18  ;;  %v1371_v18 = vld [vmem:[%s1713_s16 + $0x17] sm:$0x1] }
 0x592   : > { %v1545_v19 = vpop.eup %1544 }
 0x593   : > { %v753_v21 = vsub.f32 1.0, %v1545_v19  ;;  %v752_v22 = vmul.f32 %v1545_v19, %v751_v20 }
 0x595   : > { %v754_v23 = vmul.f32 %v753_v21, %v678_v17  ;;  %v857_v17 = vunpack.c.l.bf16 %v1370_v15 }
 0x597   : > { %v755_v24 = vadd.f32 %v754_v23, %v752_v22 }
 0x599   : > { %1359 = vst.msk [vmem:[%s1724_s19 + $0x6] sm:$0x3] %vm372_vm1, %v755_v24  ;;  %v770_v25 = vpack.c.bf16 %v755_v24, %v755_v24 }
 0x59b   : > { %1457 = vmatmul.mubr.msk.bf16.vlgmr.msra.gmra.mxu0 %vm406_vm2, %v770_v25 }
 0x59c   : > { %1469 = vmatpush3.bf16.msra.mxu0 %v1673_v1  ;;  %1472 = vmatprep.mubr.msk.bf16.mxu0 %vm1603_vm0, %v1602_v0 }
 0x59d   : > { %1470 = vmatprep.subr.bf16.mxu0 %v1602_v0 }
 0x5a0   : > { %1471 = vmatpush3.bf16.msra.mxu0 %v1683_v2 }
 0x65b   : > { %v808_v26 = vpop.f32.mrf.mxu0 }
 0x65c   : > { %v828_v27 = vrot.slane %v808_v26, %v1705_v12  ;;  %v814_v33 = vadd.f32 %v808_v26, %v760_v32 }
 0x65d   : > { %v1458_v28 = vpop.f32.mrf.mxu0 }
 0x65e   : > { %829 = vrot.lane.b32.xlu0 %v828_v27, %s1605_s12  ;;  %v1365_v34 = vmul.f32 -1.442695, %v814_v33 }
 0x65f   : > { %v811_v29 = vpop.f32.mrf.mxu0 }
 0x660   : > { %1546 = vpow2.f32 %v1365_v34  ;;  %v1376_v34 = vld [vmem:[%s1713_s16 + $0x18] sm:$0x1] }
 0x661   : > { %v1459_v30 = vpop.f32.mrf.mxu0  ;;  %v942_v35 = vunpack.c.l.bf16 %v1376_v34 }
 0x66d   : > { %v1547_v40 = vpop.eup %1546 }
 0x66e   : > { %v818_v41 = vadd.f32 1.0, %v1547_v40 }
 0x6d0   : > { %v830_v37 = vpop.permute.xlu0 %829 }
 0x6d1   : > { %v832_v38 = vadd.f32 %v830_v37, %v763_v36 }
 0x6d3   : > { %v1366_v39 = vmul.f32 -1.442695, %v832_v38  ;;  %v1377_v38 = vld [vmem:[%s1713_s16 + $0x19] sm:$0x1] }
 0x6d5   : > { %1548 = vpow2.f32 %v1366_v39  ;;  %v945_v39 = vunpack.c.l.bf16 %v1377_v38 }
 0x6d6   : > { %1550 = vrcp.f32 %v818_v41 }
 0x6e2   : > { %v1549_v42 = vpop.eup %1548 }
 0x6e3   : > { %v836_v43 = vadd.f32 1.0, %v1549_v42  ;;  %v1551_v44 = vpop.eup %1550 }
 0x6e4   : > { %v840_v46 = vsub.f32 1.0, %v1551_v44  ;;  %v839_v51 = vmul.f32 %v1551_v44, %v751_v20  ;;  %v860_v20 = vunpack.c.l.bf16 %v1371_v18 }
 0x6e5   : > { %1552 = vrcp.f32 %v836_v43 }
 0x6e6   : > { %v841_v49 = vmul.f32 %v840_v46, %v766_v47 }
 0x6e8   : > { %v842_v53 = vadd.f32 %v841_v49, %v839_v51  ;;  %v1379_v51 = vld [vmem:[%s1713_s16 + $0x1b] sm:$0x1] }
 0x6f2   : > { %v1553_v52 = vpop.eup %1552 }
 0x6f3   : > { %v844_v54 = vsub.f32 1.0, %v1553_v52  ;;  %v843_v55 = vmul.f32 %v1553_v52, %v842_v53 }
 0x6f5   : > { %v845_v56 = vmul.f32 %v844_v54, %v769_v50  ;;  %v948_v50 = vunpack.c.l.bf16 %v1378_v48 }
 0x6f7   : > { %v846_v57 = vadd.f32 %v845_v56, %v843_v55 }
 0x6f9   : > { %1367 = vst.msk [vmem:[%s1724_s19 + $0x8] sm:$0x3] %vm372_vm1, %v846_v57  ;;  %v861_v58 = vpack.c.bf16 %v846_v57, %v846_v57 }
 0x6fb   : > { %1465 = vmatmul.mubr.msk.bf16.vlgmr.msra.gmra.mxu1 %vm406_vm2, %v861_v58 }
 0x6fc   : > { %1477 = vmatpush3.bf16.msra.mxu1 %v1673_v1  ;;  %1480 = vmatprep.mubr.msk.bf16.mxu1 %vm1603_vm0, %v1602_v0 }
 0x6fd   : > { %1478 = vmatprep.subr.bf16.mxu1 %v1602_v0 }
 0x700   : > { %1479 = vmatpush3.bf16.msra.mxu1 %v1683_v2 }
 0x7bb   : > { %v899_v59 = vpop.f32.mrf.mxu1 }
 0x7bc   : > { %v919_v60 = vrot.slane %v899_v59, %v1705_v12  ;;  %v905_v5 = vadd.f32 %v899_v59, %v851_v4 }
 0x7bd   : > { %v1466_v61 = vpop.f32.mrf.mxu1 }
 0x7be   : > { %920 = vrot.lane.b32.xlu1 %v919_v60, %s1605_s12  ;;  %v1373_v1 = vmul.f32 -1.442695, %v905_v5 }
 0x7bf   : > { %v902_v62 = vpop.f32.mrf.mxu1 }
 0x7c0   : > { %1554 = vpow2.f32 %v1373_v1  ;;  %v1384_v62 = vld [vmem:[%s1713_s16 + $0x1c] sm:$0x1] }
 0x7c1   : > { %v1467_v63 = vpop.f32.mrf.mxu1 }
 0x7c2   : > { %v1033_v63 = vunpack.c.l.bf16 %v1384_v62 }
 0x7cd   : > { %v1555_v9 = vpop.eup %1554 }
 0x7ce   : > { %v909_v10 = vadd.f32 1.0, %v1555_v9  ;;  %v1386_v9 = vld [vmem:[%s1713_s16 + $0x1e] sm:$0x1] }
 0x830   : > { %v921_v0 = vpop.permute.xlu1 %920 }
 0x831   : > { %v923_v8 = vadd.f32 %v921_v0, %v854_v7 }
 0x833   : > { %v1374_v2 = vmul.f32 -1.442695, %v923_v8 }
 0x835   : > { %1556 = vpow2.f32 %v1374_v2 }
 0x836   : > { %1558 = vrcp.f32 %v909_v10  ;;  %v1039_v10 = vunpack.c.l.bf16 %v1386_v9 }
 0x842   : > { %v1557_v11 = vpop.eup %1556 }
 0x843   : > { %v927_v13 = vadd.f32 1.0, %v1557_v11  ;;  %v1559_v14 = vpop.eup %1558 }
 0x844   : > { %v931_v16 = vsub.f32 1.0, %v1559_v14  ;;  %v930_v21 = vmul.f32 %v1559_v14, %v842_v53  ;;  %v951_v53 = vunpack.c.l.bf16 %v1379_v51 }
 0x845   : > { %1560 = vrcp.f32 %v927_v13 }
 0x846   : > { %v932_v19 = vmul.f32 %v931_v16, %v857_v17  ;;  %v1385_v16 = vld [vmem:[%s1713_s16 + $0x1d] sm:$0x1] }
 0x847   : > { %v1036_v17 = vunpack.c.l.bf16 %v1385_v16 }
 0x848   : > { %v933_v23 = vadd.f32 %v932_v19, %v930_v21 }
 0x852   : > { %v1561_v22 = vpop.eup %1560 }
 0x853   : > { %v935_v24 = vsub.f32 1.0, %v1561_v22  ;;  %v934_v25 = vmul.f32 %v1561_v22, %v933_v23 }
 0x855   : > { %v936_v26 = vmul.f32 %v935_v24, %v860_v20 }
 0x857   : > { %v937_v27 = vadd.f32 %v936_v26, %v934_v25 }
 0x859   : > { %1375 = vst.msk [vmem:[%s1724_s19 + $0xa] sm:$0x3] %vm372_vm1, %v937_v27  ;;  %v952_v28 = vpack.c.bf16 %v937_v27, %v937_v27 }
 0x85b   : > { %1473 = vmatmul.mubr.msk.bf16.vlgmr.msra.gmra.mxu0 %vm406_vm2, %v952_v28 }
 0x91b   : > { %v990_v29 = vpop.f32.mrf.mxu0 }
 0x91c   : > { %v1010_v30 = vrot.slane %v990_v29, %v1705_v12  ;;  %v996_v36 = vadd.f32 %v990_v29, %v942_v35 }
 0x91d   : > { %v1474_v31 = vpop.f32.mrf.mxu0 }
 0x91e   : > { %1011 = vrot.lane.b32.xlu0 %v1010_v30, %s1605_s12  ;;  %v1381_v37 = vmul.f32 -1.442695, %v996_v36 }
 0x91f   : > { %v993_v32 = vpop.f32.mrf.mxu0 }
 0x920   : > { %1562 = vpow2.f32 %v1381_v37 }
 0x921   : > { %v1475_v33 = vpop.f32.mrf.mxu0 }
 0x92d   : > { %v1563_v43 = vpop.eup %1562 }
 0x92e   : > { %v1000_v44 = vadd.f32 1.0, %v1563_v43 }
 0x990   : > { %v1012_v40 = vpop.permute.xlu0 %1011 }
 0x991   : > { %v1014_v41 = vadd.f32 %v1012_v40, %v945_v39 }
 0x993   : > { %v1382_v42 = vmul.f32 -1.442695, %v1014_v41 }
 0x995   : > { %1564 = vpow2.f32 %v1382_v42 }
 0x996   : > { %1566 = vrcp.f32 %v1000_v44 }
 0x9a2   : > { %v1565_v45 = vpop.eup %1564 }
 0x9a3   : > { %v1018_v46 = vadd.f32 1.0, %v1565_v45  ;;  %v1567_v47 = vpop.eup %1566 }
 0x9a4   : > { %v1022_v49 = vsub.f32 1.0, %v1567_v47  ;;  %v1021_v54 = vmul.f32 %v1567_v47, %v933_v23  ;;  %v1387_v23 = vld [vmem:[%s1713_s16 + $0x1f] sm:$0x1] }
 0x9a5   : > { %1568 = vrcp.f32 %v1018_v46  ;;  %v1042_v24 = vunpack.c.l.bf16 %v1387_v23 }
 0x9a6   : > { %v1023_v52 = vmul.f32 %v1022_v49, %v948_v50 }
 0x9a8   : > { %v1024_v56 = vadd.f32 %v1023_v52, %v1021_v54 }
 0x9b2   : > { %v1569_v55 = vpop.eup %1568 }
 0x9b3   : > { %v1026_v57 = vsub.f32 1.0, %v1569_v55  ;;  %v1025_v58 = vmul.f32 %v1569_v55, %v1024_v56 }
 0x9b5   : > { %v1027_v59 = vmul.f32 %v1026_v57, %v951_v53 }
 0x9b7   : > { %v1028_v60 = vadd.f32 %v1027_v59, %v1025_v58 }
 0x9b9   : > { %1383 = vst.msk [vmem:[%s1724_s19 + $0xc] sm:$0x3] %vm372_vm1, %v1028_v60  ;;  %v1043_v61 = vpack.c.bf16 %v1028_v60, %v1028_v60 }
 0x9bb   : > { %1481 = vmatmul.mubr.msk.bf16.vlgmr.msra.gmra.mxu1 %vm406_vm2, %v1043_v61 }
 0xa7b   : > { %v1081_v3 = vpop.f32.mrf.mxu1 }
 0xa7c   : > { %v1087_v4 = vadd.f32 %v1081_v3, %v1033_v63  ;;  %v1101_v5 = vrot.slane %v1081_v3, %v1705_v12 }
 0xa7d   : > { %v1482_v1 = vpop.f32.mrf.mxu1 }
 0xa7e   : > { %v1389_v6 = vmul.f32 -1.442695, %v1087_v4  ;;  %1102 = vrot.lane.b32.xlu1 %v1101_v5, %s1605_s12 }
 0xa7f   : > { %v1084_v7 = vpop.f32.mrf.mxu1 }
 0xa80   : > { %1570 = vpow2.f32 %v1389_v6 }
 0xa81   : > { %v1483_v0 = vpop.f32.mrf.mxu1 }
 0xa8d   : > { %v1571_v8 = vpop.eup %1570 }
 0xa8e   : > { %v1091_v2 = vadd.f32 1.0, %v1571_v8 }
 0xa90   : > { %1572 = vrcp.f32 %v1091_v2 }
 0xa9d   : > { %v1573_v11 = vpop.eup %1572 }
 0xa9e   : > { %v1113_v13 = vsub.f32 1.0, %v1573_v11  ;;  %v1112_v14 = vmul.f32 %v1573_v11, %v1024_v56 }
 0xaa0   : > { %v1114_v15 = vmul.f32 %v1113_v13, %v1039_v10 }
 0xaa2   : > { %v1115_v12 = vadd.f32 %v1114_v15, %v1112_v14 }
 0xaa4   : > { %1123 = vst.msk [vmem:[#allocation3] sm:$0x3] %vm372_vm1, %v1115_v12  ;;  %1128 = vst.msk [vmem:[%s365_s25] sm:$0x3] %vm372_vm1, %v1115_v12 }
 0xaf0   : > { %v1103_v18 = vpop.permute.xlu1 %1102 }
 0xaf1   : > { %v1105_v19 = vadd.f32 %v1103_v18, %v1036_v17 }
 0xaf3   : > { %v1390_v20 = vmul.f32 -1.442695, %v1105_v19 }
 0xaf5   : > { %1574 = vpow2.f32 %v1390_v20 }
 0xb02   : > { %v1575_v21 = vpop.eup %1574 }
 0xb03   : > { %v1109_v22 = vadd.f32 1.0, %v1575_v21 }
 0xb05   : > { %1576 = vrcp.f32 %v1109_v22 }
 0xb12   : > { %v1577_v25 = vpop.eup %1576 }
 0xb13   : > { %v1117_v26 = vsub.f32 1.0, %v1577_v25  ;;  %v1116_v27 = vmul.f32 %v1577_v25, %v1115_v12 }
 0xb15   : > { %v1118_v28 = vmul.f32 %v1117_v26, %v1042_v24 }
 0xb17   : > { %v1119_v29 = vadd.f32 %v1118_v28, %v1116_v27 }
 0xb19   : > { %1391 = vst.msk [vmem:[%s1724_s19 + $0xe] sm:$0x3] %vm372_vm1, %v1119_v29  ;;  %1122 = vst.msk [vmem:[#allocation2] sm:$0x3] %vm372_vm1, %v1119_v29 }
 0xb1a   : > { %1127 = vst.msk [vmem:[%s361_s28] sm:$0x3] %vm372_vm1, %v1119_v29 }
 0xb1b PF: > { %s17_s23 = sadd.s32 1, %s1600_s23   ;;  %s1847_s21 = smov %s1596_s22 }
 0xb1c   : > { %p14_p5 = scmp.ge.s32.totalorder %s17_s23, 4   ;;  %s1848_s22 = smov %s1850_s24 }
 0xb1e   :  { %16 = sbr.rel (!%p14_p5) target bundleno = 2 (0x2), region = 145 }

</bundles_post_ra>
